<compile_context>
chip_gen: v7x
topology: tpu7x:2x2x1
jax: 0.10.0
libtpu: 0.0.40
codegen_flags: <defaults>
</compile_context>

<pallas_src>
import jax
import jax.numpy as jnp
import numpy as np
from jax import lax
from jax.experimental import pallas as pl
from jax.experimental.pallas import tpu as pltpu

INPUT_SIZE = 3
HIDDEN = 64
NUM_LAYERS = 2          # hard-wired: two stacked LSTM cells (wavefronted)
NUM_CLASSES = 4

PACKED = 2 * HIDDEN     # 128: lane-packed state [h0 | h1]
GATES = 4 * PACKED      # 512: packed gates [i0 i1 | f0 f1 | o0 o1 | g0 g1]
OUT_PAD = 128           # FC output padded to a full lane width
SUBLANE = 8             # batch padded to a multiple of 8


# ----------------------------------------------------------------------------
# Kernel
# ----------------------------------------------------------------------------
def fatigue_rnn_kernel(add_ref, wbig_ref, wfc_ref, bfc_ref, out_ref):
    """add_ref : (T+1, Bp, 512) per-step additive (hoisted layer-0 input
                 projection + layer-1 bias, wavefront boundaries pre-masked).
    wbig_ref  : (128, 512) block recurrent weights [[Whh0, Wih1], [0, Whh1]],
                gate-column permuted to the packed layout.
    wfc_ref   : (128, 128) FC weights (top half zero -> only h1 contributes).
    """
    n_steps, Bp, _ = add_ref.shape          # n_steps = T + 1 (wavefront)
    P = PACKED

    z = jnp.zeros((Bp, P), jnp.float32)

    def step(k, carry):
        h, c = carry
        # Single MXU push per iteration covering BOTH layers.
        gates = add_ref[k] + jnp.dot(
            h, wbig_ref[...],
            preferred_element_type=jnp.float32,
            precision=lax.Precision.DEFAULT)
        # Every slice below is a 128-lane-aligned full vreg (both layers).
        i = jax.nn.sigmoid(gates[:, 0 * P:1 * P])
        f = jax.nn.sigmoid(gates[:, 1 * P:2 * P])
        o = jax.nn.sigmoid(gates[:, 2 * P:3 * P])
        g = jnp.tanh(gates[:, 3 * P:4 * P])
        c = f * c + i * g
        h = o * jnp.tanh(c)
        return (h, c)

    h, _ = lax.fori_loop(0, n_steps, step, (z, z), unroll=True)

    # Dropout(p=0.5) is identity in eval mode; FC head on the packed state
    # (the zero top half of wfc discards the stale layer-0 lanes).
    out_ref[...] = (jnp.dot(h, wfc_ref[...],
                            preferred_element_type=jnp.float32,
                            precision=lax.Precision.DEFAULT)
                    + bfc_ref[...])


# ----------------------------------------------------------------------------
# Wrapper (host-side fusion / packing / padding + pallas_call)
# ----------------------------------------------------------------------------
def _pack_perm(H):
    """Column permutation: source [i0 f0 g0 o0 | i1 f1 g1 o1] (PyTorch gate
    order, H lanes each) -> packed [i0 i1 | f0 f1 | o0 o1 | g0 g1]."""
    def blk(layer, gate):      # gate index in PyTorch order: 0=i, 1=f, 2=g, 3=o
        s = layer * 4 * H + gate * H
        return np.arange(s, s + H)
    return np.concatenate([blk(0, 0), blk(1, 0),    # i
                           blk(0, 1), blk(1, 1),    # f
                           blk(0, 3), blk(1, 3),    # o
                           blk(0, 2), blk(1, 2)])   # g


@jax.jit
def fatigue_rnn_forward(x_btI, params):
    """x_btI: (B, T, I) float32 (PyTorch batch_first layout)."""
    (w_ih0, w_hh0, b0, w_ih1, w_hh1, b1, w_fc, b_fc) = params
    B, T, I = x_btI.shape
    H, C = HIDDEN, NUM_CLASSES
    Bp = max(SUBLANE, ((B + SUBLANE - 1) // SUBLANE) * SUBLANE)
    perm = _pack_perm(H)

    # ---- block recurrent weight (128, 512): rows = packed [h0 | h1] -------
    #      [[ W_hh0 , W_ih1 ],
    #       [   0   , W_hh1 ]]        then gate-column permuted.
    wbig = jnp.zeros((PACKED, GATES), jnp.float32)
    wbig = wbig.at[:H, :4 * H].set(w_hh0)
    wbig = wbig.at[:H, 4 * H:].set(w_ih1)
    wbig = wbig.at[H:, 4 * H:].set(w_hh1)
    wbig = wbig[:, perm]

    # ---- hoisted layer-0 input projection (off the serial critical path) --
    gx = jnp.einsum('bti,ig->tbg', x_btI, w_ih0) + b0            # (T, B, 4H)

    # ---- per-step additive with wavefront boundary masking ----------------
    # iteration k: layer 0 consumes gx[k]   (only for k < T),
    #              layer 1 consumes b1      (only for k >= 1; zero at k = 0
    #              keeps the layer-1 state exactly zero for the warm-up step).
    add = jnp.zeros((T + 1, Bp, GATES), jnp.float32)
    add = add.at[:T, :B, :4 * H].set(gx)
    add = add.at[1:, :, 4 * H:].set(jnp.broadcast_to(b1, (T, Bp, 4 * H)))
    add = add[:, :, perm]

    # ---- FC head on the packed state (only h1 rows are non-zero) ----------
    wfc = jnp.zeros((PACKED, OUT_PAD), jnp.float32).at[H:, :C].set(w_fc)
    bfc = jnp.zeros((1, OUT_PAD), jnp.float32).at[:, :C].set(b_fc)

    vmem = pl.BlockSpec(memory_space=pltpu.MemorySpace.VMEM)
    out = pl.pallas_call(
        fatigue_rnn_kernel,
        out_shape=jax.ShapeDtypeStruct((Bp, OUT_PAD), jnp.float32),
        in_specs=[vmem] * 4,
        out_specs=vmem,
    )(add, wbig, wfc, bfc)
    return out[:B, :C]


# ----------------------------------------------------------------------------
# Parameters + pure-JAX reference (PyTorch layout / gate order)
# ----------------------------------------------------------------------------
def init_params(key):
    """Deterministic synthetic parameters (PyTorch-style U(-1/sqrt(H), 1/sqrt(H))).
    LSTM weights stored pre-transposed: W_ih -> (in, 4H), W_hh -> (H, 4H),
    gate order [i, f, g, o] along the 4H axis. b = b_ih + b_hh (fused)."""
    H, I, C = HIDDEN, INPUT_SIZE, NUM_CLASSES
    k = 1.0 / np.sqrt(H)
    keys = jax.random.split(key, 8)

    def u(kk, shape):
        return jax.random.uniform(kk, shape, jnp.float32, minval=-k, maxval=k)

    w_ih0 = u(keys[0], (I, 4 * H))
    w_hh0 = u(keys[1], (H, 4 * H))
    b0 = u(keys[2], (1, 4 * H))
    w_ih1 = u(keys[3], (H, 4 * H))
    w_hh1 = u(keys[4], (H, 4 * H))
    b1 = u(keys[5], (1, 4 * H))
    w_fc = u(keys[6], (H, C))
    b_fc = u(keys[7], (1, C))
    return (w_ih0, w_hh0, b0, w_ih1, w_hh1, b1, w_fc, b_fc)


def _lstm_cell_ref(x_in, h, c, w_ih, w_hh, b, H):
    gates = jnp.dot(x_in, w_ih) + jnp.dot(h, w_hh) + b
    i = jax.nn.sigmoid(gates[:, 0 * H:1 * H])
    f = jax.nn.sigmoid(gates[:, 1 * H:2 * H])
    g = jnp.tanh(gates[:, 2 * H:3 * H])
    o = jax.nn.sigmoid(gates[:, 3 * H:4 * H])
    c_new = f * c + i * g
    h_new = o * jnp.tanh(c_new)
    return h_new, c_new


def fatigue_rnn_reference(x_btI, params):
    """Pure-JAX reference of the same forward pass (for validation)."""
    (w_ih0, w_hh0, b0, w_ih1, w_hh1, b1, w_fc, b_fc) = params
    B, T, I = x_btI.shape
    H = HIDDEN

    def step(carry, x_t):
        h0, c0, h1, c1 = carry
        h0, c0 = _lstm_cell_ref(x_t, h0, c0, w_ih0, w_hh0, b0, H)
        h1, c1 = _lstm_cell_ref(h0, h1, c1, w_ih1, w_hh1, b1, H)
        return (h0, c0, h1, c1), None

    init = tuple(jnp.zeros((B, H), jnp.float32) for _ in range(4))
    (h0, c0, h1, c1), _ = lax.scan(step, init, jnp.transpose(x_btI, (1, 0, 2)))
    return jnp.dot(h1, w_fc) + b_fc   # dropout is identity in eval mode


if __name__ == "__main__":
    B, T = 2, 8
    key = jax.random.PRNGKey(0)
    k_x, k_p = jax.random.split(key)

    x = jax.random.normal(k_x, (B, T, INPUT_SIZE), jnp.float32)
    params = init_params(k_p)

    out = jax.block_until_ready(fatigue_rnn_forward(x, params))
    ref = jax.block_until_ready(fatigue_rnn_reference(x, params))

    assert out.shape == (B, NUM_CLASSES)
    assert jnp.allclose(out, ref, atol=1e-4, rtol=1e-4), (out, ref)

    print("KERNEL_OK")
</pallas_src>

<mosaic_0001>
module attributes {stable_mosaic.version = 11 : i64} {
  func.func @fatigue_rnn_kernel(%arg0: memref<9x8x512xf32, #tpu.memory_space<vmem>>, %arg1: memref<128x512xf32, #tpu.memory_space<vmem>>, %arg2: memref<128x128xf32, #tpu.memory_space<vmem>>, %arg3: memref<1x128xf32, #tpu.memory_space<vmem>>, %arg4: memref<8x128xf32, #tpu.memory_space<vmem>>) attributes {dimension_semantics = [], scalar_prefetch = 0 : i64, scratch_operands = 0 : i64, tpu.core_type = #tpu.core_type<tc>} {
    %cst = arith.constant 0.000000e+00 : f32
    %0 = vector.broadcast %cst : f32 to vector<8x128xf32>
    %c0_i32 = arith.constant 0 : i32
    %1 = arith.index_cast %c0_i32 : i32 to index
    %c0 = arith.constant 0 : index
    %c0_0 = arith.constant 0 : index
    %2 = vector.load %arg0[%1, %c0, %c0_0] : memref<9x8x512xf32, #tpu.memory_space<vmem>>, vector<1x8x512xf32>
    %3 = vector.shape_cast %2 : vector<1x8x512xf32> to vector<8x512xf32>
    %c0_1 = arith.constant 0 : index
    %c0_2 = arith.constant 0 : index
    %4 = vector.load %arg1[%c0_1, %c0_2] : memref<128x512xf32, #tpu.memory_space<vmem>>, vector<128x512xf32>
    %cst_3 = arith.constant dense<0.000000e+00> : vector<8x512xf32>
    %5 = tpu.matmul %0, %4, %cst_3 {dimension_numbers = #tpu.dot_dimension_numbers<[1], [0], [0], [1], [0, 0, 1, 1], [], []>} : vector<8x128xf32>, vector<128x512xf32>, vector<8x512xf32> -> vector<8x512xf32>
    %6 = arith.addf %3, %5 : vector<8x512xf32>
    %7 = vector.extract_strided_slice %6 {offsets = [0, 0], sizes = [8, 128], strides = [1, 1]} : vector<8x512xf32> to vector<8x128xf32>
    %8 = arith.negf %7 : vector<8x128xf32>
    %9 = math.exp %8 : vector<8x128xf32>
    %cst_4 = arith.constant 1.000000e+00 : f32
    %10 = vector.broadcast %cst_4 : f32 to vector<8x128xf32>
    %11 = arith.addf %10, %9 : vector<8x128xf32>
    %12 = arith.divf %10, %11 : vector<8x128xf32>
    %13 = vector.extract_strided_slice %6 {offsets = [0, 128], sizes = [8, 128], strides = [1, 1]} : vector<8x512xf32> to vector<8x128xf32>
    %14 = arith.negf %13 : vector<8x128xf32>
    %15 = math.exp %14 : vector<8x128xf32>
    %cst_5 = arith.constant 1.000000e+00 : f32
    %16 = vector.broadcast %cst_5 : f32 to vector<8x128xf32>
    %17 = arith.addf %16, %15 : vector<8x128xf32>
    %18 = arith.divf %16, %17 : vector<8x128xf32>
    %19 = vector.extract_strided_slice %6 {offsets = [0, 256], sizes = [8, 128], strides = [1, 1]} : vector<8x512xf32> to vector<8x128xf32>
    %20 = arith.negf %19 : vector<8x128xf32>
    %21 = math.exp %20 : vector<8x128xf32>
    %cst_6 = arith.constant 1.000000e+00 : f32
    %22 = vector.broadcast %cst_6 : f32 to vector<8x128xf32>
    %23 = arith.addf %22, %21 : vector<8x128xf32>
    %24 = arith.divf %22, %23 : vector<8x128xf32>
    %25 = vector.extract_strided_slice %6 {offsets = [0, 384], sizes = [8, 128], strides = [1, 1]} : vector<8x512xf32> to vector<8x128xf32>
    %26 = math.tanh %25 : vector<8x128xf32>
    %27 = arith.mulf %18, %0 : vector<8x128xf32>
    %28 = arith.mulf %12, %26 : vector<8x128xf32>
    %29 = arith.addf %27, %28 : vector<8x128xf32>
    %30 = math.tanh %29 : vector<8x128xf32>
    %31 = arith.mulf %24, %30 : vector<8x128xf32>
    %c1_i32 = arith.constant 1 : i32
    %32 = arith.index_cast %c1_i32 : i32 to index
    %c0_7 = arith.constant 0 : index
    %c0_8 = arith.constant 0 : index
    %33 = vector.load %arg0[%32, %c0_7, %c0_8] : memref<9x8x512xf32, #tpu.memory_space<vmem>>, vector<1x8x512xf32>
    %34 = vector.shape_cast %33 : vector<1x8x512xf32> to vector<8x512xf32>
    %c0_9 = arith.constant 0 : index
    %c0_10 = arith.constant 0 : index
    %35 = vector.load %arg1[%c0_9, %c0_10] : memref<128x512xf32, #tpu.memory_space<vmem>>, vector<128x512xf32>
    %cst_11 = arith.constant dense<0.000000e+00> : vector<8x512xf32>
    %36 = tpu.matmul %31, %35, %cst_11 {dimension_numbers = #tpu.dot_dimension_numbers<[1], [0], [0], [1], [0, 0, 1, 1], [], []>} : vector<8x128xf32>, vector<128x512xf32>, vector<8x512xf32> -> vector<8x512xf32>
    %37 = arith.addf %34, %36 : vector<8x512xf32>
    %38 = vector.extract_strided_slice %37 {offsets = [0, 0], sizes = [8, 128], strides = [1, 1]} : vector<8x512xf32> to vector<8x128xf32>
    %39 = arith.negf %38 : vector<8x128xf32>
    %40 = math.exp %39 : vector<8x128xf32>
    %cst_12 = arith.constant 1.000000e+00 : f32
    %41 = vector.broadcast %cst_12 : f32 to vector<8x128xf32>
    %42 = arith.addf %41, %40 : vector<8x128xf32>
    %43 = arith.divf %41, %42 : vector<8x128xf32>
    %44 = vector.extract_strided_slice %37 {offsets = [0, 128], sizes = [8, 128], strides = [1, 1]} : vector<8x512xf32> to vector<8x128xf32>
    %45 = arith.negf %44 : vector<8x128xf32>
    %46 = math.exp %45 : vector<8x128xf32>
    %cst_13 = arith.constant 1.000000e+00 : f32
    %47 = vector.broadcast %cst_13 : f32 to vector<8x128xf32>
    %48 = arith.addf %47, %46 : vector<8x128xf32>
    %49 = arith.divf %47, %48 : vector<8x128xf32>
    %50 = vector.extract_strided_slice %37 {offsets = [0, 256], sizes = [8, 128], strides = [1, 1]} : vector<8x512xf32> to vector<8x128xf32>
    %51 = arith.negf %50 : vector<8x128xf32>
    %52 = math.exp %51 : vector<8x128xf32>
    %cst_14 = arith.constant 1.000000e+00 : f32
    %53 = vector.broadcast %cst_14 : f32 to vector<8x128xf32>
    %54 = arith.addf %53, %52 : vector<8x128xf32>
    %55 = arith.divf %53, %54 : vector<8x128xf32>
    %56 = vector.extract_strided_slice %37 {offsets = [0, 384], sizes = [8, 128], strides = [1, 1]} : vector<8x512xf32> to vector<8x128xf32>
    %57 = math.tanh %56 : vector<8x128xf32>
    %58 = arith.mulf %49, %29 : vector<8x128xf32>
    %59 = arith.mulf %43, %57 : vector<8x128xf32>
    %60 = arith.addf %58, %59 : vector<8x128xf32>
    %61 = math.tanh %60 : vector<8x128xf32>
    %62 = arith.mulf %55, %61 : vector<8x128xf32>
    %c2_i32 = arith.constant 2 : i32
    %63 = arith.index_cast %c2_i32 : i32 to index
    %c0_15 = arith.constant 0 : index
    %c0_16 = arith.constant 0 : index
    %64 = vector.load %arg0[%63, %c0_15, %c0_16] : memref<9x8x512xf32, #tpu.memory_space<vmem>>, vector<1x8x512xf32>
    %65 = vector.shape_cast %64 : vector<1x8x512xf32> to vector<8x512xf32>
    %c0_17 = arith.constant 0 : index
    %c0_18 = arith.constant 0 : index
    %66 = vector.load %arg1[%c0_17, %c0_18] : memref<128x512xf32, #tpu.memory_space<vmem>>, vector<128x512xf32>
    %cst_19 = arith.constant dense<0.000000e+00> : vector<8x512xf32>
    %67 = tpu.matmul %62, %66, %cst_19 {dimension_numbers = #tpu.dot_dimension_numbers<[1], [0], [0], [1], [0, 0, 1, 1], [], []>} : vector<8x128xf32>, vector<128x512xf32>, vector<8x512xf32> -> vector<8x512xf32>
    %68 = arith.addf %65, %67 : vector<8x512xf32>
    %69 = vector.extract_strided_slice %68 {offsets = [0, 0], sizes = [8, 128], strides = [1, 1]} : vector<8x512xf32> to vector<8x128xf32>
    %70 = arith.negf %69 : vector<8x128xf32>
    %71 = math.exp %70 : vector<8x128xf32>
    %cst_20 = arith.constant 1.000000e+00 : f32
    %72 = vector.broadcast %cst_20 : f32 to vector<8x128xf32>
    %73 = arith.addf %72, %71 : vector<8x128xf32>
    %74 = arith.divf %72, %73 : vector<8x128xf32>
    %75 = vector.extract_strided_slice %68 {offsets = [0, 128], sizes = [8, 128], strides = [1, 1]} : vector<8x512xf32> to vector<8x128xf32>
    %76 = arith.negf %75 : vector<8x128xf32>
    %77 = math.exp %76 : vector<8x128xf32>
    %cst_21 = arith.constant 1.000000e+00 : f32
    %78 = vector.broadcast %cst_21 : f32 to vector<8x128xf32>
    %79 = arith.addf %78, %77 : vector<8x128xf32>
    %80 = arith.divf %78, %79 : vector<8x128xf32>
    %81 = vector.extract_strided_slice %68 {offsets = [0, 256], sizes = [8, 128], strides = [1, 1]} : vector<8x512xf32> to vector<8x128xf32>
    %82 = arith.negf %81 : vector<8x128xf32>
    %83 = math.exp %82 : vector<8x128xf32>
    %cst_22 = arith.constant 1.000000e+00 : f32
    %84 = vector.broadcast %cst_22 : f32 to vector<8x128xf32>
    %85 = arith.addf %84, %83 : vector<8x128xf32>
    %86 = arith.divf %84, %85 : vector<8x128xf32>
    %87 = vector.extract_strided_slice %68 {offsets = [0, 384], sizes = [8, 128], strides = [1, 1]} : vector<8x512xf32> to vector<8x128xf32>
    %88 = math.tanh %87 : vector<8x128xf32>
    %89 = arith.mulf %80, %60 : vector<8x128xf32>
    %90 = arith.mulf %74, %88 : vector<8x128xf32>
    %91 = arith.addf %89, %90 : vector<8x128xf32>
    %92 = math.tanh %91 : vector<8x128xf32>
    %93 = arith.mulf %86, %92 : vector<8x128xf32>
    %c3_i32 = arith.constant 3 : i32
    %94 = arith.index_cast %c3_i32 : i32 to index
    %c0_23 = arith.constant 0 : index
    %c0_24 = arith.constant 0 : index
    %95 = vector.load %arg0[%94, %c0_23, %c0_24] : memref<9x8x512xf32, #tpu.memory_space<vmem>>, vector<1x8x512xf32>
    %96 = vector.shape_cast %95 : vector<1x8x512xf32> to vector<8x512xf32>
    %c0_25 = arith.constant 0 : index
    %c0_26 = arith.constant 0 : index
    %97 = vector.load %arg1[%c0_25, %c0_26] : memref<128x512xf32, #tpu.memory_space<vmem>>, vector<128x512xf32>
    %cst_27 = arith.constant dense<0.000000e+00> : vector<8x512xf32>
    %98 = tpu.matmul %93, %97, %cst_27 {dimension_numbers = #tpu.dot_dimension_numbers<[1], [0], [0], [1], [0, 0, 1, 1], [], []>} : vector<8x128xf32>, vector<128x512xf32>, vector<8x512xf32> -> vector<8x512xf32>
    %99 = arith.addf %96, %98 : vector<8x512xf32>
    %100 = vector.extract_strided_slice %99 {offsets = [0, 0], sizes = [8, 128], strides = [1, 1]} : vector<8x512xf32> to vector<8x128xf32>
    %101 = arith.negf %100 : vector<8x128xf32>
    %102 = math.exp %101 : vector<8x128xf32>
    %cst_28 = arith.constant 1.000000e+00 : f32
    %103 = vector.broadcast %cst_28 : f32 to vector<8x128xf32>
    %104 = arith.addf %103, %102 : vector<8x128xf32>
    %105 = arith.divf %103, %104 : vector<8x128xf32>
    %106 = vector.extract_strided_slice %99 {offsets = [0, 128], sizes = [8, 128], strides = [1, 1]} : vector<8x512xf32> to vector<8x128xf32>
    %107 = arith.negf %106 : vector<8x128xf32>
    %108 = math.exp %107 : vector<8x128xf32>
    %cst_29 = arith.constant 1.000000e+00 : f32
    %109 = vector.broadcast %cst_29 : f32 to vector<8x128xf32>
    %110 = arith.addf %109, %108 : vector<8x128xf32>
    %111 = arith.divf %109, %110 : vector<8x128xf32>
    %112 = vector.extract_strided_slice %99 {offsets = [0, 256], sizes = [8, 128], strides = [1, 1]} : vector<8x512xf32> to vector<8x128xf32>
    %113 = arith.negf %112 : vector<8x128xf32>
    %114 = math.exp %113 : vector<8x128xf32>
    %cst_30 = arith.constant 1.000000e+00 : f32
    %115 = vector.broadcast %cst_30 : f32 to vector<8x128xf32>
    %116 = arith.addf %115, %114 : vector<8x128xf32>
    %117 = arith.divf %115, %116 : vector<8x128xf32>
    %118 = vector.extract_strided_slice %99 {offsets = [0, 384], sizes = [8, 128], strides = [1, 1]} : vector<8x512xf32> to vector<8x128xf32>
    %119 = math.tanh %118 : vector<8x128xf32>
    %120 = arith.mulf %111, %91 : vector<8x128xf32>
    %121 = arith.mulf %105, %119 : vector<8x128xf32>
    %122 = arith.addf %120, %121 : vector<8x128xf32>
    %123 = math.tanh %122 : vector<8x128xf32>
    %124 = arith.mulf %117, %123 : vector<8x128xf32>
    %c4_i32 = arith.constant 4 : i32
    %125 = arith.index_cast %c4_i32 : i32 to index
    %c0_31 = arith.constant 0 : index
    %c0_32 = arith.constant 0 : index
    %126 = vector.load %arg0[%125, %c0_31, %c0_32] : memref<9x8x512xf32, #tpu.memory_space<vmem>>, vector<1x8x512xf32>
    %127 = vector.shape_cast %126 : vector<1x8x512xf32> to vector<8x512xf32>
    %c0_33 = arith.constant 0 : index
    %c0_34 = arith.constant 0 : index
    %128 = vector.load %arg1[%c0_33, %c0_34] : memref<128x512xf32, #tpu.memory_space<vmem>>, vector<128x512xf32>
    %cst_35 = arith.constant dense<0.000000e+00> : vector<8x512xf32>
    %129 = tpu.matmul %124, %128, %cst_35 {dimension_numbers = #tpu.dot_dimension_numbers<[1], [0], [0], [1], [0, 0, 1, 1], [], []>} : vector<8x128xf32>, vector<128x512xf32>, vector<8x512xf32> -> vector<8x512xf32>
    %130 = arith.addf %127, %129 : vector<8x512xf32>
    %131 = vector.extract_strided_slice %130 {offsets = [0, 0], sizes = [8, 128], strides = [1, 1]} : vector<8x512xf32> to vector<8x128xf32>
    %132 = arith.negf %131 : vector<8x128xf32>
    %133 = math.exp %132 : vector<8x128xf32>
    %cst_36 = arith.constant 1.000000e+00 : f32
    %134 = vector.broadcast %cst_36 : f32 to vector<8x128xf32>
    %135 = arith.addf %134, %133 : vector<8x128xf32>
    %136 = arith.divf %134, %135 : vector<8x128xf32>
    %137 = vector.extract_strided_slice %130 {offsets = [0, 128], sizes = [8, 128], strides = [1, 1]} : vector<8x512xf32> to vector<8x128xf32>
    %138 = arith.negf %137 : vector<8x128xf32>
    %139 = math.exp %138 : vector<8x128xf32>
    %cst_37 = arith.constant 1.000000e+00 : f32
    %140 = vector.broadcast %cst_37 : f32 to vector<8x128xf32>
    %141 = arith.addf %140, %139 : vector<8x128xf32>
    %142 = arith.divf %140, %141 : vector<8x128xf32>
    %143 = vector.extract_strided_slice %130 {offsets = [0, 256], sizes = [8, 128], strides = [1, 1]} : vector<8x512xf32> to vector<8x128xf32>
    %144 = arith.negf %143 : vector<8x128xf32>
    %145 = math.exp %144 : vector<8x128xf32>
    %cst_38 = arith.constant 1.000000e+00 : f32
    %146 = vector.broadcast %cst_38 : f32 to vector<8x128xf32>
    %147 = arith.addf %146, %145 : vector<8x128xf32>
    %148 = arith.divf %146, %147 : vector<8x128xf32>
    %149 = vector.extract_strided_slice %130 {offsets = [0, 384], sizes = [8, 128], strides = [1, 1]} : vector<8x512xf32> to vector<8x128xf32>
    %150 = math.tanh %149 : vector<8x128xf32>
    %151 = arith.mulf %142, %122 : vector<8x128xf32>
    %152 = arith.mulf %136, %150 : vector<8x128xf32>
    %153 = arith.addf %151, %152 : vector<8x128xf32>
    %154 = math.tanh %153 : vector<8x128xf32>
    %155 = arith.mulf %148, %154 : vector<8x128xf32>
    %c5_i32 = arith.constant 5 : i32
    %156 = arith.index_cast %c5_i32 : i32 to index
    %c0_39 = arith.constant 0 : index
    %c0_40 = arith.constant 0 : index
    %157 = vector.load %arg0[%156, %c0_39, %c0_40] : memref<9x8x512xf32, #tpu.memory_space<vmem>>, vector<1x8x512xf32>
    %158 = vector.shape_cast %157 : vector<1x8x512xf32> to vector<8x512xf32>
    %c0_41 = arith.constant 0 : index
    %c0_42 = arith.constant 0 : index
    %159 = vector.load %arg1[%c0_41, %c0_42] : memref<128x512xf32, #tpu.memory_space<vmem>>, vector<128x512xf32>
    %cst_43 = arith.constant dense<0.000000e+00> : vector<8x512xf32>
    %160 = tpu.matmul %155, %159, %cst_43 {dimension_numbers = #tpu.dot_dimension_numbers<[1], [0], [0], [1], [0, 0, 1, 1], [], []>} : vector<8x128xf32>, vector<128x512xf32>, vector<8x512xf32> -> vector<8x512xf32>
    %161 = arith.addf %158, %160 : vector<8x512xf32>
    %162 = vector.extract_strided_slice %161 {offsets = [0, 0], sizes = [8, 128], strides = [1, 1]} : vector<8x512xf32> to vector<8x128xf32>
    %163 = arith.negf %162 : vector<8x128xf32>
    %164 = math.exp %163 : vector<8x128xf32>
    %cst_44 = arith.constant 1.000000e+00 : f32
    %165 = vector.broadcast %cst_44 : f32 to vector<8x128xf32>
    %166 = arith.addf %165, %164 : vector<8x128xf32>
    %167 = arith.divf %165, %166 : vector<8x128xf32>
    %168 = vector.extract_strided_slice %161 {offsets = [0, 128], sizes = [8, 128], strides = [1, 1]} : vector<8x512xf32> to vector<8x128xf32>
    %169 = arith.negf %168 : vector<8x128xf32>
    %170 = math.exp %169 : vector<8x128xf32>
    %cst_45 = arith.constant 1.000000e+00 : f32
    %171 = vector.broadcast %cst_45 : f32 to vector<8x128xf32>
    %172 = arith.addf %171, %170 : vector<8x128xf32>
    %173 = arith.divf %171, %172 : vector<8x128xf32>
    %174 = vector.extract_strided_slice %161 {offsets = [0, 256], sizes = [8, 128], strides = [1, 1]} : vector<8x512xf32> to vector<8x128xf32>
    %175 = arith.negf %174 : vector<8x128xf32>
    %176 = math.exp %175 : vector<8x128xf32>
    %cst_46 = arith.constant 1.000000e+00 : f32
    %177 = vector.broadcast %cst_46 : f32 to vector<8x128xf32>
    %178 = arith.addf %177, %176 : vector<8x128xf32>
    %179 = arith.divf %177, %178 : vector<8x128xf32>
    %180 = vector.extract_strided_slice %161 {offsets = [0, 384], sizes = [8, 128], strides = [1, 1]} : vector<8x512xf32> to vector<8x128xf32>
    %181 = math.tanh %180 : vector<8x128xf32>
    %182 = arith.mulf %173, %153 : vector<8x128xf32>
    %183 = arith.mulf %167, %181 : vector<8x128xf32>
    %184 = arith.addf %182, %183 : vector<8x128xf32>
    %185 = math.tanh %184 : vector<8x128xf32>
    %186 = arith.mulf %179, %185 : vector<8x128xf32>
    %c6_i32 = arith.constant 6 : i32
    %187 = arith.index_cast %c6_i32 : i32 to index
    %c0_47 = arith.constant 0 : index
    %c0_48 = arith.constant 0 : index
    %188 = vector.load %arg0[%187, %c0_47, %c0_48] : memref<9x8x512xf32, #tpu.memory_space<vmem>>, vector<1x8x512xf32>
    %189 = vector.shape_cast %188 : vector<1x8x512xf32> to vector<8x512xf32>
    %c0_49 = arith.constant 0 : index
    %c0_50 = arith.constant 0 : index
    %190 = vector.load %arg1[%c0_49, %c0_50] : memref<128x512xf32, #tpu.memory_space<vmem>>, vector<128x512xf32>
    %cst_51 = arith.constant dense<0.000000e+00> : vector<8x512xf32>
    %191 = tpu.matmul %186, %190, %cst_51 {dimension_numbers = #tpu.dot_dimension_numbers<[1], [0], [0], [1], [0, 0, 1, 1], [], []>} : vector<8x128xf32>, vector<128x512xf32>, vector<8x512xf32> -> vector<8x512xf32>
    %192 = arith.addf %189, %191 : vector<8x512xf32>
    %193 = vector.extract_strided_slice %192 {offsets = [0, 0], sizes = [8, 128], strides = [1, 1]} : vector<8x512xf32> to vector<8x128xf32>
    %194 = arith.negf %193 : vector<8x128xf32>
    %195 = math.exp %194 : vector<8x128xf32>
    %cst_52 = arith.constant 1.000000e+00 : f32
    %196 = vector.broadcast %cst_52 : f32 to vector<8x128xf32>
    %197 = arith.addf %196, %195 : vector<8x128xf32>
    %198 = arith.divf %196, %197 : vector<8x128xf32>
    %199 = vector.extract_strided_slice %192 {offsets = [0, 128], sizes = [8, 128], strides = [1, 1]} : vector<8x512xf32> to vector<8x128xf32>
    %200 = arith.negf %199 : vector<8x128xf32>
    %201 = math.exp %200 : vector<8x128xf32>
    %cst_53 = arith.constant 1.000000e+00 : f32
    %202 = vector.broadcast %cst_53 : f32 to vector<8x128xf32>
    %203 = arith.addf %202, %201 : vector<8x128xf32>
    %204 = arith.divf %202, %203 : vector<8x128xf32>
    %205 = vector.extract_strided_slice %192 {offsets = [0, 256], sizes = [8, 128], strides = [1, 1]} : vector<8x512xf32> to vector<8x128xf32>
    %206 = arith.negf %205 : vector<8x128xf32>
    %207 = math.exp %206 : vector<8x128xf32>
    %cst_54 = arith.constant 1.000000e+00 : f32
    %208 = vector.broadcast %cst_54 : f32 to vector<8x128xf32>
    %209 = arith.addf %208, %207 : vector<8x128xf32>
    %210 = arith.divf %208, %209 : vector<8x128xf32>
    %211 = vector.extract_strided_slice %192 {offsets = [0, 384], sizes = [8, 128], strides = [1, 1]} : vector<8x512xf32> to vector<8x128xf32>
    %212 = math.tanh %211 : vector<8x128xf32>
    %213 = arith.mulf %204, %184 : vector<8x128xf32>
    %214 = arith.mulf %198, %212 : vector<8x128xf32>
    %215 = arith.addf %213, %214 : vector<8x128xf32>
    %216 = math.tanh %215 : vector<8x128xf32>
    %217 = arith.mulf %210, %216 : vector<8x128xf32>
    %c7_i32 = arith.constant 7 : i32
    %218 = arith.index_cast %c7_i32 : i32 to index
    %c0_55 = arith.constant 0 : index
    %c0_56 = arith.constant 0 : index
    %219 = vector.load %arg0[%218, %c0_55, %c0_56] : memref<9x8x512xf32, #tpu.memory_space<vmem>>, vector<1x8x512xf32>
    %220 = vector.shape_cast %219 : vector<1x8x512xf32> to vector<8x512xf32>
    %c0_57 = arith.constant 0 : index
    %c0_58 = arith.constant 0 : index
    %221 = vector.load %arg1[%c0_57, %c0_58] : memref<128x512xf32, #tpu.memory_space<vmem>>, vector<128x512xf32>
    %cst_59 = arith.constant dense<0.000000e+00> : vector<8x512xf32>
    %222 = tpu.matmul %217, %221, %cst_59 {dimension_numbers = #tpu.dot_dimension_numbers<[1], [0], [0], [1], [0, 0, 1, 1], [], []>} : vector<8x128xf32>, vector<128x512xf32>, vector<8x512xf32> -> vector<8x512xf32>
    %223 = arith.addf %220, %222 : vector<8x512xf32>
    %224 = vector.extract_strided_slice %223 {offsets = [0, 0], sizes = [8, 128], strides = [1, 1]} : vector<8x512xf32> to vector<8x128xf32>
    %225 = arith.negf %224 : vector<8x128xf32>
    %226 = math.exp %225 : vector<8x128xf32>
    %cst_60 = arith.constant 1.000000e+00 : f32
    %227 = vector.broadcast %cst_60 : f32 to vector<8x128xf32>
    %228 = arith.addf %227, %226 : vector<8x128xf32>
    %229 = arith.divf %227, %228 : vector<8x128xf32>
    %230 = vector.extract_strided_slice %223 {offsets = [0, 128], sizes = [8, 128], strides = [1, 1]} : vector<8x512xf32> to vector<8x128xf32>
    %231 = arith.negf %230 : vector<8x128xf32>
    %232 = math.exp %231 : vector<8x128xf32>
    %cst_61 = arith.constant 1.000000e+00 : f32
    %233 = vector.broadcast %cst_61 : f32 to vector<8x128xf32>
    %234 = arith.addf %233, %232 : vector<8x128xf32>
    %235 = arith.divf %233, %234 : vector<8x128xf32>
    %236 = vector.extract_strided_slice %223 {offsets = [0, 256], sizes = [8, 128], strides = [1, 1]} : vector<8x512xf32> to vector<8x128xf32>
    %237 = arith.negf %236 : vector<8x128xf32>
    %238 = math.exp %237 : vector<8x128xf32>
    %cst_62 = arith.constant 1.000000e+00 : f32
    %239 = vector.broadcast %cst_62 : f32 to vector<8x128xf32>
    %240 = arith.addf %239, %238 : vector<8x128xf32>
    %241 = arith.divf %239, %240 : vector<8x128xf32>
    %242 = vector.extract_strided_slice %223 {offsets = [0, 384], sizes = [8, 128], strides = [1, 1]} : vector<8x512xf32> to vector<8x128xf32>
    %243 = math.tanh %242 : vector<8x128xf32>
    %244 = arith.mulf %235, %215 : vector<8x128xf32>
    %245 = arith.mulf %229, %243 : vector<8x128xf32>
    %246 = arith.addf %244, %245 : vector<8x128xf32>
    %247 = math.tanh %246 : vector<8x128xf32>
    %248 = arith.mulf %241, %247 : vector<8x128xf32>
    %c8_i32 = arith.constant 8 : i32
    %249 = arith.index_cast %c8_i32 : i32 to index
    %c0_63 = arith.constant 0 : index
    %c0_64 = arith.constant 0 : index
    %250 = vector.load %arg0[%249, %c0_63, %c0_64] : memref<9x8x512xf32, #tpu.memory_space<vmem>>, vector<1x8x512xf32>
    %251 = vector.shape_cast %250 : vector<1x8x512xf32> to vector<8x512xf32>
    %c0_65 = arith.constant 0 : index
    %c0_66 = arith.constant 0 : index
    %252 = vector.load %arg1[%c0_65, %c0_66] : memref<128x512xf32, #tpu.memory_space<vmem>>, vector<128x512xf32>
    %cst_67 = arith.constant dense<0.000000e+00> : vector<8x512xf32>
    %253 = tpu.matmul %248, %252, %cst_67 {dimension_numbers = #tpu.dot_dimension_numbers<[1], [0], [0], [1], [0, 0, 1, 1], [], []>} : vector<8x128xf32>, vector<128x512xf32>, vector<8x512xf32> -> vector<8x512xf32>
    %254 = arith.addf %251, %253 : vector<8x512xf32>
    %255 = vector.extract_strided_slice %254 {offsets = [0, 0], sizes = [8, 128], strides = [1, 1]} : vector<8x512xf32> to vector<8x128xf32>
    %256 = arith.negf %255 : vector<8x128xf32>
    %257 = math.exp %256 : vector<8x128xf32>
    %cst_68 = arith.constant 1.000000e+00 : f32
    %258 = vector.broadcast %cst_68 : f32 to vector<8x128xf32>
    %259 = arith.addf %258, %257 : vector<8x128xf32>
    %260 = arith.divf %258, %259 : vector<8x128xf32>
    %261 = vector.extract_strided_slice %254 {offsets = [0, 128], sizes = [8, 128], strides = [1, 1]} : vector<8x512xf32> to vector<8x128xf32>
    %262 = arith.negf %261 : vector<8x128xf32>
    %263 = math.exp %262 : vector<8x128xf32>
    %cst_69 = arith.constant 1.000000e+00 : f32
    %264 = vector.broadcast %cst_69 : f32 to vector<8x128xf32>
    %265 = arith.addf %264, %263 : vector<8x128xf32>
    %266 = arith.divf %264, %265 : vector<8x128xf32>
    %267 = vector.extract_strided_slice %254 {offsets = [0, 256], sizes = [8, 128], strides = [1, 1]} : vector<8x512xf32> to vector<8x128xf32>
    %268 = arith.negf %267 : vector<8x128xf32>
    %269 = math.exp %268 : vector<8x128xf32>
    %cst_70 = arith.constant 1.000000e+00 : f32
    %270 = vector.broadcast %cst_70 : f32 to vector<8x128xf32>
    %271 = arith.addf %270, %269 : vector<8x128xf32>
    %272 = arith.divf %270, %271 : vector<8x128xf32>
    %273 = vector.extract_strided_slice %254 {offsets = [0, 384], sizes = [8, 128], strides = [1, 1]} : vector<8x512xf32> to vector<8x128xf32>
    %274 = math.tanh %273 : vector<8x128xf32>
    %275 = arith.mulf %266, %246 : vector<8x128xf32>
    %276 = arith.mulf %260, %274 : vector<8x128xf32>
    %277 = arith.addf %275, %276 : vector<8x128xf32>
    %278 = math.tanh %277 : vector<8x128xf32>
    %279 = arith.mulf %272, %278 : vector<8x128xf32>
    %c9_i32 = arith.constant 9 : i32
    %c0_71 = arith.constant 0 : index
    %c0_72 = arith.constant 0 : index
    %280 = vector.load %arg2[%c0_71, %c0_72] : memref<128x128xf32, #tpu.memory_space<vmem>>, vector<128x128xf32>
    %cst_73 = arith.constant dense<0.000000e+00> : vector<8x128xf32>
    %281 = tpu.matmul %279, %280, %cst_73 {dimension_numbers = #tpu.dot_dimension_numbers<[1], [0], [0], [1], [0, 0, 1, 1], [], []>} : vector<8x128xf32>, vector<128x128xf32>, vector<8x128xf32> -> vector<8x128xf32>
    %c0_74 = arith.constant 0 : index
    %c0_75 = arith.constant 0 : index
    %282 = vector.load %arg3[%c0_74, %c0_75] : memref<1x128xf32, #tpu.memory_space<vmem>>, vector<1x128xf32>
    %283 = vector.broadcast %282 : vector<1x128xf32> to vector<8x128xf32>
    %284 = arith.addf %281, %283 : vector<8x128xf32>
    %c0_76 = arith.constant 0 : index
    %c0_77 = arith.constant 0 : index
    %285 = vector.load %arg4[%c0_76, %c0_77] : memref<8x128xf32, #tpu.memory_space<vmem>>, vector<8x128xf32>
    tpu.vector_store %arg4[%c0_76, %c0_77], %284 {strides = array<i32>} : memref<8x128xf32, #tpu.memory_space<vmem>>, vector<8x128xf32>,
    return
  }
}

</mosaic_0001>

<bundles_post_ra>
// kernel: fatigue_rnn_forward.1
= control target key start
LH: loop header
LB: loop body
LE: loop exit
PB: predicated region body
PF: predicated region fallthrough
CT: control target
= control target key end

     0   :  { %v2612_v3 = vmov 0.0   ;;  %vm2614_vm0 = vmmov 0   ;;  %s3399_s1 = inlined_call_operand.vmem [shape: f32[128,512], index: 1, kind: input, shape index: {}]   ;;  %s3400_s0 = inlined_call_operand.vmem [shape: f32[9,8,512], index: 0, kind: input, shape index: {}]   ;;  %s3401_s2 = inlined_call_operand.vmem [shape: f32[128,128], index: 2, kind: input, shape index: {}]   ;;  %s3402_s3 = inlined_call_operand.vmem [shape: f32[1,128], index: 3, kind: input, shape index: {}]   ;;  %s3403_s4 = inlined_call_operand.vmem [shape: f32[8,128], index: 4, kind: output, shape index: {}]  }
   0x1   :  { %v22_v0 = vld [vmem:[%s3399_s1 + $0x8] sm:$0xff]  ;;  %v21_v2 = vld [vmem:[%s3399_s1] sm:$0xff]  ;;  %149 = vmatprep.mubr.f32.mxu0 %v2612_v3  ;;  %220 = vmatprep.mubr.f32.mxu1 %v2612_v3  ;;  %v24_v19 = vld [vmem:[%s3399_s1 + $0x18] sm:$0xff] }
   0x2   :  { %v26_v1 = vld [vmem:[%s3399_s1 + $0x28] sm:$0xff]  ;;  %v25_v5 = vld [vmem:[%s3399_s1 + $0x20] sm:$0xff]  ;;  %v28_v20 = vld [vmem:[%s3399_s1 + $0x38] sm:$0xff] }
   0x3   :  { %v2651_v4 = vpack.c.bf16 %v26_v1, %v22_v0  ;;  %v30_v6 = vld [vmem:[%s3399_s1 + $0x48] sm:$0xff]  ;;  %v2662_v8 = vpack.c.bf16 %v25_v5, %v21_v2  ;;  %v29_v10 = vld [vmem:[%s3399_s1 + $0x40] sm:$0xff]  ;;  %v2703_v22 = vpack.c.bf16 %v28_v20, %v24_v19  ;;  %v23_v23 = vld [vmem:[%s3399_s1 + $0x10] sm:$0xff] }
   0x4   :  { %v34_v7 = vld [vmem:[%s3399_s1 + $0x68] sm:$0xff]  ;;  %v33_v11 = vld [vmem:[%s3399_s1 + $0x60] sm:$0xff]  ;;  %v27_v24 = vld [vmem:[%s3399_s1 + $0x30] sm:$0xff] }
   0x5   :  { %v2664_v9 = vpack.c.bf16 %v34_v7, %v30_v6  ;;  %v38_v12 = vld [vmem:[%s3399_s1 + $0x88] sm:$0xff]  ;;  %1866 = vmatprep.subr.bf16.mxu0 %v2651_v4  ;;  %v2680_v14 = vpack.c.bf16 %v33_v11, %v29_v10  ;;  %v37_v15 = vld [vmem:[%s3399_s1 + $0x80] sm:$0xff]  ;;  %v2711_v25 = vpack.c.bf16 %v27_v24, %v23_v23  ;;  %1898 = vmatprep.subr.bf16.mxu1 %v2703_v22  ;;  %v32_v27 = vld [vmem:[%s3399_s1 + $0x58] sm:$0xff] }
   0x6   :  { %v42_v13 = vld [vmem:[%s3399_s1 + $0xa8] sm:$0xff]  ;;  %1868 = vmatpush1.bf16.msra.mxu0 %v2662_v8  ;;  %v41_v16 = vld [vmem:[%s3399_s1 + $0xa0] sm:$0xff]  ;;  %v36_v28 = vld [vmem:[%s3399_s1 + $0x78] sm:$0xff] }
   0x7   :  { %1870 = vmatprep.subr.bf16.mxu0 %v2664_v9  ;;  %v2689_v17 = vpack.c.bf16 %v42_v13, %v38_v12  ;;  %v46_v18 = vld [vmem:[%s3399_s1 + $0xc8] sm:$0xff]  ;;  %v2714_v26 = vpack.c.bf16 %v41_v16, %v37_v15  ;;  %v31_v29 = vld [vmem:[%s3399_s1 + $0x50] sm:$0xff]  ;;  %v45_v31 = vld [vmem:[%s3399_s1 + $0xc0] sm:$0xff]  ;;  %1900 = vmatpush1.bf16.msra.mxu1 %v2711_v25  ;;  %v2736_v33 = vpack.c.bf16 %v36_v28, %v32_v27 }
   0x8   :  { %v50_v21 = vld [vmem:[%s3399_s1 + $0xe8] sm:$0xff]  ;;  %v49_v32 = vld [vmem:[%s3399_s1 + $0xe0] sm:$0xff]  ;;  %v35_v34 = vld [vmem:[%s3399_s1 + $0x70] sm:$0xff] }
   0x9   :  { %v2727_v30 = vpack.c.bf16 %v50_v21, %v46_v18  ;;  %v54_v35 = vld [vmem:[%s3399_s1 + $0x108] sm:$0xff]  ;;  %v2747_v37 = vpack.c.bf16 %v35_v34, %v31_v29  ;;  %v40_v38 = vld [vmem:[%s3399_s1 + $0x98] sm:$0xff]  ;;  %1902 = vmatprep.subr.bf16.mxu1 %v2736_v33  ;;  %v39_v40 = vld [vmem:[%s3399_s1 + $0x90] sm:$0xff]  ;;  %v2763_v42 = vpack.c.bf16 %v49_v32, %v45_v31 }
   0xa   :  { %1872 = vmatpush1.bf16.msra.mxu0 %v2680_v14  ;;  %v58_v36 = vld [vmem:[%s3399_s1 + $0x128] sm:$0xff]  ;;  %v44_v39 = vld [vmem:[%s3399_s1 + $0xb8] sm:$0xff]  ;;  %v43_v41 = vld [vmem:[%s3399_s1 + $0xb0] sm:$0xff] }
   0xb   :  { %1874 = vmatprep.subr.bf16.mxu0 %v2689_v17  ;;  %v53_v43 = vld [vmem:[%s3399_s1 + $0x100] sm:$0xff]  ;;  %v2771_v45 = vpack.c.bf16 %v44_v39, %v40_v38  ;;  %v2774_v46 = vpack.c.bf16 %v58_v36, %v54_v35  ;;  %1904 = vmatpush1.bf16.msra.mxu1 %v2747_v37  ;;  %v62_v47 = vld [vmem:[%s3399_s1 + $0x148] sm:$0xff]  ;;  %v2780_v48 = vpack.c.bf16 %v43_v41, %v39_v40  ;;  %v48_v49 = vld [vmem:[%s3399_s1 + $0xd8] sm:$0xff] }
   0xc   :  { %v57_v44 = vld [vmem:[%s3399_s1 + $0x120] sm:$0xff]  ;;  %v52_v50 = vld [vmem:[%s3399_s1 + $0xf8] sm:$0xff]  ;;  %v66_v51 = vld [vmem:[%s3399_s1 + $0x168] sm:$0xff] }
   0xd   :  { %1906 = vmatprep.subr.bf16.mxu1 %v2771_v45  ;;  %v2792_v52 = vpack.c.bf16 %v52_v50, %v48_v49  ;;  %v47_v53 = vld [vmem:[%s3399_s1 + $0xd0] sm:$0xff]  ;;  %v2801_v55 = vpack.c.bf16 %v57_v44, %v53_v43  ;;  %v56_v56 = vld [vmem:[%s3399_s1 + $0x118] sm:$0xff]  ;;  %v2810_v58 = vpack.c.bf16 %v66_v51, %v62_v47  ;;  %v61_v59 = vld [vmem:[%s3399_s1 + $0x140] sm:$0xff] }
   0xe   :  { %1876 = vmatpush1.bf16.msra.mxu0 %v2714_v26  ;;  %v51_v54 = vld [vmem:[%s3399_s1 + $0xf0] sm:$0xff]  ;;  %v60_v57 = vld [vmem:[%s3399_s1 + $0x138] sm:$0xff]  ;;  %v65_v60 = vld [vmem:[%s3399_s1 + $0x160] sm:$0xff] }
   0xf   :  { %1878 = vmatprep.subr.bf16.mxu0 %v2727_v30  ;;  %1908 = vmatpush1.bf16.msra.mxu1 %v2780_v48  ;;  %v70_v61 = vld [vmem:[%s3399_s1 + $0x188] sm:$0xff]  ;;  %v2822_v62 = vpack.c.bf16 %v51_v54, %v47_v53  ;;  %v2828_v0 = vpack.c.bf16 %v60_v57, %v56_v56  ;;  %v55_v1 = vld [vmem:[%s3399_s1 + $0x110] sm:$0xff]  ;;  %v64_v5 = vld [vmem:[%s3399_s1 + $0x158] sm:$0xff]  ;;  %v2843_v7 = vpack.c.bf16 %v65_v60, %v61_v59 }
  0x10   :  { %v74_v63 = vld [vmem:[%s3399_s1 + $0x1a8] sm:$0xff]  ;;  %1910 = vmatprep.subr.bf16.mxu1 %v2792_v52  ;;  %v59_v2 = vld [vmem:[%s3399_s1 + $0x130] sm:$0xff]  ;;  %v68_v6 = vld [vmem:[%s3399_s1 + $0x178] sm:$0xff] }
  0x11   :  { %v2846_v10 = vpack.c.bf16 %v74_v63, %v70_v61  ;;  %v69_v11 = vld [vmem:[%s3399_s1 + $0x180] sm:$0xff]  ;;  %v78_v13 = vld [vmem:[%s3399_s1 + $0x1c8] sm:$0xff]  ;;  %v2858_v15 = vpack.c.bf16 %v59_v2, %v55_v1  ;;  %v2864_v18 = vpack.c.bf16 %v68_v6, %v64_v5  ;;  %v63_v19 = vld [vmem:[%s3399_s1 + $0x150] sm:$0xff] }
  0x12   :  { %1880 = vmatpush1.bf16.msra.mxu0 %v2763_v42  ;;  %v73_v12 = vld [vmem:[%s3399_s1 + $0x1a0] sm:$0xff]  ;;  %v82_v16 = vld [vmem:[%s3399_s1 + $0x1e8] sm:$0xff]  ;;  %v67_v20 = vld [vmem:[%s3399_s1 + $0x170] sm:$0xff] }
  0x13   :  { %1882 = vmatprep.subr.bf16.mxu0 %v2774_v46  ;;  %1912 = vmatpush1.bf16.msra.mxu1 %v2822_v62  ;;  %v72_v21 = vld [vmem:[%s3399_s1 + $0x198] sm:$0xff]  ;;  %v2879_v24 = vpack.c.bf16 %v73_v12, %v69_v11  ;;  %v2882_v27 = vpack.c.bf16 %v82_v16, %v78_v13  ;;  %v77_v28 = vld [vmem:[%s3399_s1 + $0x1c0] sm:$0xff]  ;;  %v2891_v31 = vpack.c.bf16 %v67_v20, %v63_v19  ;;  %v71_v34 = vld [vmem:[%s3399_s1 + $0x190] sm:$0xff] }
  0x14   :  { %1914 = vmatprep.subr.bf16.mxu1 %v2828_v0  ;;  %v76_v23 = vld [vmem:[%s3399_s1 + $0x1b8] sm:$0xff]  ;;  %v81_v29 = vld [vmem:[%s3399_s1 + $0x1e0] sm:$0xff]  ;;  %v75_v35 = vld [vmem:[%s3399_s1 + $0x1b0] sm:$0xff] }
  0x15   :  { %v2894_v32 = vpack.c.bf16 %v76_v23, %v72_v21  ;;  %v80_v36 = vld [vmem:[%s3399_s1 + $0x1d8] sm:$0xff]  ;;  %v2909_v39 = vpack.c.bf16 %v81_v29, %v77_v28  ;;  %v2913_v40 = vpack.c.bf16 %v75_v35, %v71_v34  ;;  %v79_v43 = vld [vmem:[%s3399_s1 + $0x1d0] sm:$0xff]  ;;  %v17_v49 = vld [vmem:[%s3400_s0] sm:$0xff] }
  0x16   :  { %1884 = vmatpush1.bf16.msra.mxu0 %v2801_v55  ;;  %v84_v38 = vld [vmem:[%s3399_s1 + $0x1f8] sm:$0xff]  ;;  %v83_v44 = vld [vmem:[%s3399_s1 + $0x1f0] sm:$0xff]  ;;  %v18_v50 = vld [vmem:[%s3400_s0 + $0x8] sm:$0xff] }
  0x17   :  { %1886 = vmatprep.subr.bf16.mxu0 %v2810_v58  ;;  %1916 = vmatpush1.bf16.msra.mxu1 %v2858_v15  ;;  %v2916_v41 = vpack.c.bf16 %v84_v38, %v80_v36  ;;  %v2926_v47 = vpack.c.bf16 %v83_v44, %v79_v43  ;;  %v19_v60 = vld [vmem:[%s3400_s0 + $0x10] sm:$0xff]  ;;  %v20_v2 = vld [vmem:[%s3400_s0 + $0x18] sm:$0xff]  ;;  %v1756_v44 = vld [vmem:[%s3400_s0 + $0x20] sm:$0xff] }
  0x18   :  { %1918 = vmatprep.subr.bf16.mxu1 %v2864_v18 }
  0x1a   :  { %1888 = vmatpush1.bf16.msra.mxu0 %v2843_v7 }
  0x1b   :  { %1890 = vmatprep.subr.bf16.mxu0 %v2846_v10  ;;  %1920 = vmatpush1.bf16.msra.mxu1 %v2891_v31 }
  0x1c   :  { %1922 = vmatprep.subr.bf16.mxu1 %v2894_v32 }
  0x1e   :  { %1892 = vmatpush1.bf16.msra.mxu0 %v2879_v24 }
  0x1f   :  { %1894 = vmatprep.subr.bf16.mxu0 %v2882_v27  ;;  %1924 = vmatpush1.bf16.msra.mxu1 %v2913_v40 }
  0x20   :  { %1926 = vmatprep.subr.bf16.mxu1 %v2916_v41 }
  0x22   :  { %1896 = vmatpush1.bf16.msra.mxu0 %v2909_v39 }
  0x23   :  { %1930 = vmatprep.subr.bf16.mxu0 %v2651_v4  ;;  %1928 = vmatpush1.bf16.msra.mxu1 %v2926_v47 }
  0x24   :  { %1962 = vmatprep.subr.bf16.mxu1 %v2703_v22 }
  0x25   :  { %150 = vmatmul.mubr.f32.vlgmr.msra.gmra.mrb[0].mxu0 %v2612_v3 }
  0x26   :  { %1932 = vmatpush1.bf16.msra.mxu0 %v2662_v8  ;;  %324 = vmatprep.mubr.f32.mxu0 %v2612_v3 }
  0x27   :  { %1934 = vmatprep.subr.bf16.mxu0 %v2664_v9  ;;  %221 = vmatmul.mubr.f32.vlgmr.msra.gmra.mrb[0].mxu1 %v2612_v3 }
  0x28   :  { %1964 = vmatpush1.bf16.msra.mxu1 %v2711_v25  ;;  %395 = vmatprep.mubr.f32.mxu1 %v2612_v3 }
  0x29   :  { %1966 = vmatprep.subr.bf16.mxu1 %v2736_v33 }
  0x2a   :  { %1936 = vmatpush1.bf16.msra.mxu0 %v2680_v14 }
  0x2b   :  { %1938 = vmatprep.subr.bf16.mxu0 %v2689_v17 }
  0x2c   :  { %1968 = vmatpush1.bf16.msra.mxu1 %v2747_v37 }
  0x2d   :  { %1970 = vmatprep.subr.bf16.mxu1 %v2771_v45 }
  0x2e   :  { %1940 = vmatpush1.bf16.msra.mxu0 %v2714_v26 }
  0x2f   :  { %1942 = vmatprep.subr.bf16.mxu0 %v2727_v30 }
  0x30   :  { %1972 = vmatpush1.bf16.msra.mxu1 %v2780_v48 }
  0x31   :  { %1974 = vmatprep.subr.bf16.mxu1 %v2792_v52 }
  0x32   :  { %1944 = vmatpush1.bf16.msra.mxu0 %v2763_v42 }
  0x33   :  { %1946 = vmatprep.subr.bf16.mxu0 %v2774_v46 }
  0x34   :  { %1976 = vmatpush1.bf16.msra.mxu1 %v2822_v62 }
  0x35   :  { %1978 = vmatprep.subr.bf16.mxu1 %v2828_v0 }
  0x36   :  { %1948 = vmatpush1.bf16.msra.mxu0 %v2801_v55 }
  0x37   :  { %1950 = vmatprep.subr.bf16.mxu0 %v2810_v58 }
  0x38   :  { %1980 = vmatpush1.bf16.msra.mxu1 %v2858_v15 }
  0x39   :  { %1982 = vmatprep.subr.bf16.mxu1 %v2864_v18 }
  0x3a   :  { %1952 = vmatpush1.bf16.msra.mxu0 %v2843_v7 }
  0x3b   :  { %1954 = vmatprep.subr.bf16.mxu0 %v2846_v10 }
  0x3c   :  { %1984 = vmatpush1.bf16.msra.mxu1 %v2891_v31 }
  0x3d   :  { %1986 = vmatprep.subr.bf16.mxu1 %v2894_v32 }
  0x3e   :  { %1956 = vmatpush1.bf16.msra.mxu0 %v2879_v24 }
  0x3f   :  { %1958 = vmatprep.subr.bf16.mxu0 %v2882_v27 }
  0x40   :  { %1988 = vmatpush1.bf16.msra.mxu1 %v2913_v40 }
  0x41   :  { %1990 = vmatprep.subr.bf16.mxu1 %v2916_v41 }
  0x42   :  { %1960 = vmatpush1.bf16.msra.mxu0 %v2909_v39 }
  0x43   :  { %1994 = vmatprep.subr.bf16.mxu0 %v2651_v4 }
  0x44   :  { %1992 = vmatpush1.bf16.msra.mxu1 %v2926_v47 }
  0x45   :  { %2026 = vmatprep.subr.bf16.mxu1 %v2703_v22 }
  0xf8   :  { %v151_v51 = vpop.f32.mrb[0].mxu0 }
  0xf9   :  { %v227_v53 = vadd.f32 %v151_v51, %v17_v49  ;;  %v153_v54 = vpop.f32.mrb[1].mxu0  ;;  %v1757_v49 = vld [vmem:[%s3400_s0 + $0x28] sm:$0xff] }
  0xfa   :  { %v228_v56 = vadd.f32 %v153_v54, %v18_v50  ;;  %v222_v61 = vpop.f32.mrb[0].mxu1 }
  0xfb   :  { %v1753_v57 = vmul.f32 -1.442695, %v227_v53  ;;  %v224_v63 = vpop.f32.mrb[1].mxu1  ;;  %v229_v1 = vadd.f32 %v222_v61, %v19_v60  ;;  %v1758_v61 = vld [vmem:[%s3400_s0 + $0x30] sm:$0xff] }
  0xfc   :  { %v1754_v59 = vmul.f32 -1.442695, %v228_v56  ;;  %v230_v6 = vadd.f32 %v224_v63, %v20_v2 }
  0xfd   :  { %2468 = vpow2.f32 %v1753_v57  ;;  %v1755_v5 = vmul.f32 -1.442695, %v229_v1  ;;  %v1759_v1 = vld [vmem:[%s3400_s0 + $0x38] sm:$0xff] }
  0xfe   :  { %2470 = vpow2.f32 %v1754_v59 }
  0xff   :  { %2472 = vpow2.f32 %v1755_v5 }
 0x100   :  { %2474 = vtanh.f32 %v230_v6 }
 0x107   :  { %v2469_v11 = vpop.eup %2468 }
 0x108   :  { %v2471_v12 = vpop.eup %2470  ;;  %v234_v13 = vadd.f32 1.0, %v2469_v11 }
 0x109   :  { %v240_v16 = vadd.f32 1.0, %v2471_v12  ;;  %v2473_v19 = vpop.eup %2472 }
 0x10a   :  { %2476 = vrcp.f32 %v234_v13  ;;  %v2475_v20 = vpop.eup %2474  ;;  %v246_v23 = vadd.f32 1.0, %v2473_v19 }
 0x10b   :  { %2478 = vrcp.f32 %v240_v16 }
 0x10c   :  { %2480 = vrcp.f32 %v246_v23 }
 0x114   :  { %v2477_v21 = vpop.eup %2476 }
 0x115   :  { %v2479_v28 = vpop.eup %2478  ;;  %v251_v29 = vmul.f32 %v2477_v21, %v2475_v20 }
 0x116   :  { %v250_v34 = vmul.f32 0.0, %v2479_v28  ;;  %v2481_v36 = vpop.eup %2480 }
 0x118   :  { %v2980_v35 = vadd.f32 %v251_v29, %v250_v34 }
 0x11a   :  { %2482 = vtanh.f32 %v2980_v35 }
 0x124   :  { %v2483_v38 = vpop.eup %2482 }
 0x125   :  { %v254_v43 = vmul.f32 %v2483_v38, %v2481_v36 }
 0x127   :  { %325 = vmatmul.mubr.f32.vlgmr.msra.gmra.mrb[2].mxu0 %v254_v43  ;;  %396 = vmatmul.mubr.f32.vlgmr.msra.gmra.mrb[2].mxu1 %v254_v43 }
 0x128   :  { %1996 = vmatpush1.bf16.msra.mxu0 %v2662_v8  ;;  %2028 = vmatpush1.bf16.msra.mxu1 %v2711_v25 }
 0x129   :  { %1998 = vmatprep.subr.bf16.mxu0 %v2664_v9  ;;  %2030 = vmatprep.subr.bf16.mxu1 %v2736_v33 }
 0x12a   :  { %499 = vmatprep.mubr.f32.mxu0 %v2612_v3  ;;  %570 = vmatprep.mubr.f32.mxu1 %v2612_v3 }
 0x12c   :  { %2000 = vmatpush1.bf16.msra.mxu0 %v2680_v14  ;;  %2032 = vmatpush1.bf16.msra.mxu1 %v2747_v37 }
 0x12d   :  { %2002 = vmatprep.subr.bf16.mxu0 %v2689_v17  ;;  %2034 = vmatprep.subr.bf16.mxu1 %v2771_v45 }
 0x130   :  { %2004 = vmatpush1.bf16.msra.mxu0 %v2714_v26  ;;  %2036 = vmatpush1.bf16.msra.mxu1 %v2780_v48 }
 0x131   :  { %2006 = vmatprep.subr.bf16.mxu0 %v2727_v30  ;;  %2038 = vmatprep.subr.bf16.mxu1 %v2792_v52 }
 0x134   :  { %2008 = vmatpush1.bf16.msra.mxu0 %v2763_v42  ;;  %2040 = vmatpush1.bf16.msra.mxu1 %v2822_v62 }
 0x135   :  { %2010 = vmatprep.subr.bf16.mxu0 %v2774_v46  ;;  %2042 = vmatprep.subr.bf16.mxu1 %v2828_v0 }
 0x138   :  { %2012 = vmatpush1.bf16.msra.mxu0 %v2801_v55  ;;  %2044 = vmatpush1.bf16.msra.mxu1 %v2858_v15 }
 0x139   :  { %2014 = vmatprep.subr.bf16.mxu0 %v2810_v58  ;;  %2046 = vmatprep.subr.bf16.mxu1 %v2864_v18 }
 0x13c   :  { %2016 = vmatpush1.bf16.msra.mxu0 %v2843_v7  ;;  %2048 = vmatpush1.bf16.msra.mxu1 %v2891_v31 }
 0x13d   :  { %2018 = vmatprep.subr.bf16.mxu0 %v2846_v10  ;;  %2050 = vmatprep.subr.bf16.mxu1 %v2894_v32 }
 0x140   :  { %2020 = vmatpush1.bf16.msra.mxu0 %v2879_v24  ;;  %2052 = vmatpush1.bf16.msra.mxu1 %v2913_v40 }
 0x141   :  { %2022 = vmatprep.subr.bf16.mxu0 %v2882_v27  ;;  %2054 = vmatprep.subr.bf16.mxu1 %v2916_v41 }
 0x144   :  { %2024 = vmatpush1.bf16.msra.mxu0 %v2909_v39  ;;  %2056 = vmatpush1.bf16.msra.mxu1 %v2926_v47 }
 0x145   :  { %2058 = vmatprep.subr.bf16.mxu0 %v2651_v4  ;;  %2090 = vmatprep.subr.bf16.mxu1 %v2703_v22 }
 0x1fa   :  { %v326_v50 = vpop.f32.mrb[2].mxu0  ;;  %v397_v51 = vpop.f32.mrb[2].mxu1 }
 0x1fb   :  { %v402_v53 = vadd.f32 %v1756_v44, %v326_v50  ;;  %v328_v54 = vpop.f32.mrb[3].mxu0  ;;  %v399_v56 = vpop.f32.mrb[3].mxu1  ;;  %v404_v63 = vadd.f32 %v1758_v61, %v397_v51  ;;  %v1764_v44 = vld [vmem:[%s3400_s0 + $0x48] sm:$0xff] }
 0x1fc   :  { %v403_v57 = vadd.f32 %v1757_v49, %v328_v54  ;;  %v405_v2 = vadd.f32 %v1759_v1, %v399_v56 }
 0x1fd   :  { %v1760_v59 = vmul.f32 -1.442695, %v402_v53  ;;  %v1762_v5 = vmul.f32 -1.442695, %v404_v63  ;;  %v1766_v63 = vld [vmem:[%s3400_s0 + $0x58] sm:$0xff] }
 0x1fe   :  { %v1761_v60 = vmul.f32 -1.442695, %v403_v57 }
 0x1ff   :  { %2484 = vpow2.f32 %v1760_v59 }
 0x200   :  { %2486 = vpow2.f32 %v1761_v60  ;;  %v1765_v60 = vld [vmem:[%s3400_s0 + $0x50] sm:$0xff] }
 0x201   :  { %2488 = vtanh.f32 %v405_v2 }
 0x202   :  { %2490 = vpow2.f32 %v1762_v5 }
 0x209   :  { %v2485_v6 = vpop.eup %2484 }
 0x20a   :  { %v409_v11 = vadd.f32 1.0, %v2485_v6  ;;  %v2487_v12 = vpop.eup %2486 }
 0x20b   :  { %v415_v13 = vadd.f32 1.0, %v2487_v12  ;;  %v2489_v16 = vpop.eup %2488 }
 0x20c   :  { %2492 = vrcp.f32 %v409_v11  ;;  %v2491_v19 = vpop.eup %2490 }
 0x20d   :  { %2494 = vrcp.f32 %v415_v13  ;;  %v421_v28 = vadd.f32 1.0, %v2491_v19 }
 0x20f   :  { %2496 = vrcp.f32 %v421_v28 }
 0x216   :  { %v2493_v20 = vpop.eup %2492 }
 0x217   :  { %v426_v21 = vmul.f32 %v2493_v20, %v2489_v16  ;;  %v2495_v23 = vpop.eup %2494 }
 0x218   :  { %v425_v29 = vmul.f32 %v2495_v23, %v2980_v35  ;;  %v1763_v35 = vld [vmem:[%s3400_s0 + $0x40] sm:$0xff] }
 0x219   :  { %v2497_v36 = vpop.eup %2496 }
 0x21a   :  { %v3030_v34 = vadd.f32 %v426_v21, %v425_v29 }
 0x21c   :  { %2498 = vtanh.f32 %v3030_v34 }
 0x226   :  { %v2499_v38 = vpop.eup %2498 }
 0x227   :  { %v429_v43 = vmul.f32 %v2499_v38, %v2497_v36 }
 0x229   :  { %500 = vmatmul.mubr.f32.vlgmr.msra.gmra.mrb[4].mxu0 %v429_v43  ;;  %571 = vmatmul.mubr.f32.vlgmr.msra.gmra.mrb[4].mxu1 %v429_v43 }
 0x22a   :  { %2060 = vmatpush1.bf16.msra.mxu0 %v2662_v8  ;;  %2092 = vmatpush1.bf16.msra.mxu1 %v2711_v25 }
 0x22b   :  { %2062 = vmatprep.subr.bf16.mxu0 %v2664_v9  ;;  %2094 = vmatprep.subr.bf16.mxu1 %v2736_v33 }
 0x22c   :  { %674 = vmatprep.mubr.f32.mxu0 %v2612_v3  ;;  %745 = vmatprep.mubr.f32.mxu1 %v2612_v3 }
 0x22e   :  { %2064 = vmatpush1.bf16.msra.mxu0 %v2680_v14  ;;  %2096 = vmatpush1.bf16.msra.mxu1 %v2747_v37 }
 0x22f   :  { %2066 = vmatprep.subr.bf16.mxu0 %v2689_v17  ;;  %2098 = vmatprep.subr.bf16.mxu1 %v2771_v45 }
 0x232   :  { %2068 = vmatpush1.bf16.msra.mxu0 %v2714_v26  ;;  %2100 = vmatpush1.bf16.msra.mxu1 %v2780_v48 }
 0x233   :  { %2070 = vmatprep.subr.bf16.mxu0 %v2727_v30  ;;  %2102 = vmatprep.subr.bf16.mxu1 %v2792_v52 }
 0x236   :  { %2072 = vmatpush1.bf16.msra.mxu0 %v2763_v42  ;;  %2104 = vmatpush1.bf16.msra.mxu1 %v2822_v62 }
 0x237   :  { %2074 = vmatprep.subr.bf16.mxu0 %v2774_v46  ;;  %2106 = vmatprep.subr.bf16.mxu1 %v2828_v0 }
 0x23a   :  { %2076 = vmatpush1.bf16.msra.mxu0 %v2801_v55  ;;  %2108 = vmatpush1.bf16.msra.mxu1 %v2858_v15 }
 0x23b   :  { %2078 = vmatprep.subr.bf16.mxu0 %v2810_v58  ;;  %2110 = vmatprep.subr.bf16.mxu1 %v2864_v18 }
 0x23e   :  { %2080 = vmatpush1.bf16.msra.mxu0 %v2843_v7  ;;  %2112 = vmatpush1.bf16.msra.mxu1 %v2891_v31 }
 0x23f   :  { %2082 = vmatprep.subr.bf16.mxu0 %v2846_v10  ;;  %2114 = vmatprep.subr.bf16.mxu1 %v2894_v32 }
 0x242   :  { %2084 = vmatpush1.bf16.msra.mxu0 %v2879_v24  ;;  %2116 = vmatpush1.bf16.msra.mxu1 %v2913_v40 }
 0x243   :  { %2086 = vmatprep.subr.bf16.mxu0 %v2882_v27  ;;  %2118 = vmatprep.subr.bf16.mxu1 %v2916_v41 }
 0x246   :  { %2088 = vmatpush1.bf16.msra.mxu0 %v2909_v39  ;;  %2120 = vmatpush1.bf16.msra.mxu1 %v2926_v47 }
 0x247   :  { %2122 = vmatprep.subr.bf16.mxu0 %v2651_v4  ;;  %2154 = vmatprep.subr.bf16.mxu1 %v2703_v22 }
 0x2fc   :  { %v501_v49 = vpop.f32.mrb[4].mxu0  ;;  %v572_v50 = vpop.f32.mrb[4].mxu1 }
 0x2fd   :  { %v577_v51 = vadd.f32 %v1763_v35, %v501_v49  ;;  %v503_v53 = vpop.f32.mrb[5].mxu0  ;;  %v574_v54 = vpop.f32.mrb[5].mxu1  ;;  %v579_v61 = vadd.f32 %v1765_v60, %v572_v50  ;;  %v1771_v35 = vld [vmem:[%s3400_s0 + $0x68] sm:$0xff] }
 0x2fe   :  { %v578_v56 = vadd.f32 %v1764_v44, %v503_v53  ;;  %v580_v1 = vadd.f32 %v1766_v63, %v574_v54 }
 0x2ff   :  { %v1767_v57 = vmul.f32 -1.442695, %v577_v51  ;;  %v1769_v2 = vmul.f32 -1.442695, %v579_v61  ;;  %v1773_v61 = vld [vmem:[%s3400_s0 + $0x78] sm:$0xff] }
 0x300   :  { %v1768_v59 = vmul.f32 -1.442695, %v578_v56 }
 0x301   :  { %2500 = vpow2.f32 %v1767_v57 }
 0x302   :  { %2502 = vpow2.f32 %v1768_v59  ;;  %v1772_v59 = vld [vmem:[%s3400_s0 + $0x70] sm:$0xff] }
 0x303   :  { %2504 = vtanh.f32 %v580_v1 }
 0x304   :  { %2506 = vpow2.f32 %v1769_v2 }
 0x30b   :  { %v2501_v5 = vpop.eup %2500 }
 0x30c   :  { %v584_v6 = vadd.f32 1.0, %v2501_v5  ;;  %v2503_v11 = vpop.eup %2502 }
 0x30d   :  { %v590_v12 = vadd.f32 1.0, %v2503_v11  ;;  %v2505_v13 = vpop.eup %2504 }
 0x30e   :  { %2508 = vrcp.f32 %v584_v6  ;;  %v2507_v16 = vpop.eup %2506 }
 0x30f   :  { %2510 = vrcp.f32 %v590_v12  ;;  %v596_v23 = vadd.f32 1.0, %v2507_v16 }
 0x311   :  { %2512 = vrcp.f32 %v596_v23 }
 0x318   :  { %v2509_v19 = vpop.eup %2508 }
 0x319   :  { %v601_v20 = vmul.f32 %v2509_v19, %v2505_v13  ;;  %v2511_v21 = vpop.eup %2510 }
 0x31a   :  { %v600_v28 = vmul.f32 %v2511_v21, %v3030_v34  ;;  %v1770_v34 = vld [vmem:[%s3400_s0 + $0x60] sm:$0xff] }
 0x31b   :  { %v2513_v36 = vpop.eup %2512 }
 0x31c   :  { %v3080_v29 = vadd.f32 %v601_v20, %v600_v28 }
 0x31e   :  { %2514 = vtanh.f32 %v3080_v29 }
 0x328   :  { %v2515_v38 = vpop.eup %2514 }
 0x329   :  { %v604_v43 = vmul.f32 %v2515_v38, %v2513_v36 }
 0x32b   :  { %675 = vmatmul.mubr.f32.vlgmr.msra.gmra.mrb[6].mxu0 %v604_v43  ;;  %746 = vmatmul.mubr.f32.vlgmr.msra.gmra.mrb[6].mxu1 %v604_v43 }
 0x32c   :  { %2124 = vmatpush1.bf16.msra.mxu0 %v2662_v8  ;;  %2156 = vmatpush1.bf16.msra.mxu1 %v2711_v25 }
 0x32d   :  { %2126 = vmatprep.subr.bf16.mxu0 %v2664_v9  ;;  %2158 = vmatprep.subr.bf16.mxu1 %v2736_v33 }
 0x32e   :  { %849 = vmatprep.mubr.f32.mxu0 %v2612_v3  ;;  %920 = vmatprep.mubr.f32.mxu1 %v2612_v3 }
 0x330   :  { %2128 = vmatpush1.bf16.msra.mxu0 %v2680_v14  ;;  %2160 = vmatpush1.bf16.msra.mxu1 %v2747_v37 }
 0x331   :  { %2130 = vmatprep.subr.bf16.mxu0 %v2689_v17  ;;  %2162 = vmatprep.subr.bf16.mxu1 %v2771_v45 }
 0x334   :  { %2132 = vmatpush1.bf16.msra.mxu0 %v2714_v26  ;;  %2164 = vmatpush1.bf16.msra.mxu1 %v2780_v48 }
 0x335   :  { %2134 = vmatprep.subr.bf16.mxu0 %v2727_v30  ;;  %2166 = vmatprep.subr.bf16.mxu1 %v2792_v52 }
 0x338   :  { %2136 = vmatpush1.bf16.msra.mxu0 %v2763_v42  ;;  %2168 = vmatpush1.bf16.msra.mxu1 %v2822_v62 }
 0x339   :  { %2138 = vmatprep.subr.bf16.mxu0 %v2774_v46  ;;  %2170 = vmatprep.subr.bf16.mxu1 %v2828_v0 }
 0x33c   :  { %2140 = vmatpush1.bf16.msra.mxu0 %v2801_v55  ;;  %2172 = vmatpush1.bf16.msra.mxu1 %v2858_v15 }
 0x33d   :  { %2142 = vmatprep.subr.bf16.mxu0 %v2810_v58  ;;  %2174 = vmatprep.subr.bf16.mxu1 %v2864_v18 }
 0x340   :  { %2144 = vmatpush1.bf16.msra.mxu0 %v2843_v7  ;;  %2176 = vmatpush1.bf16.msra.mxu1 %v2891_v31 }
 0x341   :  { %2146 = vmatprep.subr.bf16.mxu0 %v2846_v10  ;;  %2178 = vmatprep.subr.bf16.mxu1 %v2894_v32 }
 0x344   :  { %2148 = vmatpush1.bf16.msra.mxu0 %v2879_v24  ;;  %2180 = vmatpush1.bf16.msra.mxu1 %v2913_v40 }
 0x345   :  { %2150 = vmatprep.subr.bf16.mxu0 %v2882_v27  ;;  %2182 = vmatprep.subr.bf16.mxu1 %v2916_v41 }
 0x348   :  { %2152 = vmatpush1.bf16.msra.mxu0 %v2909_v39  ;;  %2184 = vmatpush1.bf16.msra.mxu1 %v2926_v47 }
 0x349   :  { %2186 = vmatprep.subr.bf16.mxu0 %v2651_v4  ;;  %2218 = vmatprep.subr.bf16.mxu1 %v2703_v22 }
 0x3fe   :  { %v676_v44 = vpop.f32.mrb[6].mxu0  ;;  %v747_v49 = vpop.f32.mrb[6].mxu1 }
 0x3ff   :  { %v752_v50 = vadd.f32 %v1770_v34, %v676_v44  ;;  %v678_v51 = vpop.f32.mrb[7].mxu0  ;;  %v749_v53 = vpop.f32.mrb[7].mxu1  ;;  %v754_v60 = vadd.f32 %v1772_v59, %v747_v49  ;;  %v1778_v34 = vld [vmem:[%s3400_s0 + $0x88] sm:$0xff] }
 0x400   :  { %v753_v54 = vadd.f32 %v1771_v35, %v678_v51  ;;  %v755_v63 = vadd.f32 %v1773_v61, %v749_v53 }
 0x401   :  { %v1774_v56 = vmul.f32 -1.442695, %v752_v50  ;;  %v1776_v1 = vmul.f32 -1.442695, %v754_v60  ;;  %v1780_v60 = vld [vmem:[%s3400_s0 + $0x98] sm:$0xff] }
 0x402   :  { %v1775_v57 = vmul.f32 -1.442695, %v753_v54 }
 0x403   :  { %2516 = vpow2.f32 %v1774_v56 }
 0x404   :  { %2518 = vpow2.f32 %v1775_v57  ;;  %v1779_v57 = vld [vmem:[%s3400_s0 + $0x90] sm:$0xff] }
 0x405   :  { %2520 = vtanh.f32 %v755_v63 }
 0x406   :  { %2522 = vpow2.f32 %v1776_v1 }
 0x40d   :  { %v2517_v2 = vpop.eup %2516 }
 0x40e   :  { %v759_v5 = vadd.f32 1.0, %v2517_v2  ;;  %v2519_v6 = vpop.eup %2518 }
 0x40f   :  { %v765_v11 = vadd.f32 1.0, %v2519_v6  ;;  %v2521_v12 = vpop.eup %2520 }
 0x410   :  { %2524 = vrcp.f32 %v759_v5  ;;  %v2523_v13 = vpop.eup %2522 }
 0x411   :  { %2526 = vrcp.f32 %v765_v11  ;;  %v771_v21 = vadd.f32 1.0, %v2523_v13 }
 0x413   :  { %2528 = vrcp.f32 %v771_v21 }
 0x41a   :  { %v2525_v16 = vpop.eup %2524 }
 0x41b   :  { %v776_v19 = vmul.f32 %v2525_v16, %v2521_v12  ;;  %v2527_v20 = vpop.eup %2526 }
 0x41c   :  { %v775_v23 = vmul.f32 %v2527_v20, %v3080_v29  ;;  %v1777_v29 = vld [vmem:[%s3400_s0 + $0x80] sm:$0xff] }
 0x41d   :  { %v2529_v36 = vpop.eup %2528 }
 0x41e   :  { %v3130_v28 = vadd.f32 %v776_v19, %v775_v23 }
 0x420   :  { %2530 = vtanh.f32 %v3130_v28 }
 0x42a   :  { %v2531_v38 = vpop.eup %2530 }
 0x42b   :  { %v779_v43 = vmul.f32 %v2531_v38, %v2529_v36 }
 0x42d   :  { %850 = vmatmul.mubr.f32.vlgmr.msra.gmra.mrb[8].mxu0 %v779_v43  ;;  %921 = vmatmul.mubr.f32.vlgmr.msra.gmra.mrb[8].mxu1 %v779_v43 }
 0x42e   :  { %2188 = vmatpush1.bf16.msra.mxu0 %v2662_v8  ;;  %2220 = vmatpush1.bf16.msra.mxu1 %v2711_v25 }
 0x42f   :  { %2190 = vmatprep.subr.bf16.mxu0 %v2664_v9  ;;  %2222 = vmatprep.subr.bf16.mxu1 %v2736_v33 }
 0x430   :  { %1024 = vmatprep.mubr.f32.mxu0 %v2612_v3  ;;  %1095 = vmatprep.mubr.f32.mxu1 %v2612_v3 }
 0x432   :  { %2192 = vmatpush1.bf16.msra.mxu0 %v2680_v14  ;;  %2224 = vmatpush1.bf16.msra.mxu1 %v2747_v37 }
 0x433   :  { %2194 = vmatprep.subr.bf16.mxu0 %v2689_v17  ;;  %2226 = vmatprep.subr.bf16.mxu1 %v2771_v45 }
 0x436   :  { %2196 = vmatpush1.bf16.msra.mxu0 %v2714_v26  ;;  %2228 = vmatpush1.bf16.msra.mxu1 %v2780_v48 }
 0x437   :  { %2198 = vmatprep.subr.bf16.mxu0 %v2727_v30  ;;  %2230 = vmatprep.subr.bf16.mxu1 %v2792_v52 }
 0x43a   :  { %2200 = vmatpush1.bf16.msra.mxu0 %v2763_v42  ;;  %2232 = vmatpush1.bf16.msra.mxu1 %v2822_v62 }
 0x43b   :  { %2202 = vmatprep.subr.bf16.mxu0 %v2774_v46  ;;  %2234 = vmatprep.subr.bf16.mxu1 %v2828_v0 }
 0x43e   :  { %2204 = vmatpush1.bf16.msra.mxu0 %v2801_v55  ;;  %2236 = vmatpush1.bf16.msra.mxu1 %v2858_v15 }
 0x43f   :  { %2206 = vmatprep.subr.bf16.mxu0 %v2810_v58  ;;  %2238 = vmatprep.subr.bf16.mxu1 %v2864_v18 }
 0x442   :  { %2208 = vmatpush1.bf16.msra.mxu0 %v2843_v7  ;;  %2240 = vmatpush1.bf16.msra.mxu1 %v2891_v31 }
 0x443   :  { %2210 = vmatprep.subr.bf16.mxu0 %v2846_v10  ;;  %2242 = vmatprep.subr.bf16.mxu1 %v2894_v32 }
 0x446   :  { %2212 = vmatpush1.bf16.msra.mxu0 %v2879_v24  ;;  %2244 = vmatpush1.bf16.msra.mxu1 %v2913_v40 }
 0x447   :  { %2214 = vmatprep.subr.bf16.mxu0 %v2882_v27  ;;  %2246 = vmatprep.subr.bf16.mxu1 %v2916_v41 }
 0x44a   :  { %2216 = vmatpush1.bf16.msra.mxu0 %v2909_v39  ;;  %2248 = vmatpush1.bf16.msra.mxu1 %v2926_v47 }
 0x44b   :  { %2250 = vmatprep.subr.bf16.mxu0 %v2651_v4  ;;  %2282 = vmatprep.subr.bf16.mxu1 %v2703_v22 }
 0x500   :  { %v851_v35 = vpop.f32.mrb[8].mxu0  ;;  %v922_v44 = vpop.f32.mrb[8].mxu1 }
 0x501   :  { %v927_v49 = vadd.f32 %v1777_v29, %v851_v35  ;;  %v853_v50 = vpop.f32.mrb[9].mxu0  ;;  %v924_v51 = vpop.f32.mrb[9].mxu1  ;;  %v929_v59 = vadd.f32 %v1779_v57, %v922_v44  ;;  %v1785_v29 = vld [vmem:[%s3400_s0 + $0xa8] sm:$0xff] }
 0x502   :  { %v928_v53 = vadd.f32 %v1778_v34, %v853_v50  ;;  %v930_v61 = vadd.f32 %v1780_v60, %v924_v51 }
 0x503   :  { %v1781_v54 = vmul.f32 -1.442695, %v927_v49  ;;  %v1783_v63 = vmul.f32 -1.442695, %v929_v59  ;;  %v1787_v59 = vld [vmem:[%s3400_s0 + $0xb8] sm:$0xff] }
 0x504   :  { %v1782_v56 = vmul.f32 -1.442695, %v928_v53 }
 0x505   :  { %2532 = vpow2.f32 %v1781_v54 }
 0x506   :  { %2534 = vpow2.f32 %v1782_v56  ;;  %v1786_v56 = vld [vmem:[%s3400_s0 + $0xb0] sm:$0xff] }
 0x507   :  { %2536 = vtanh.f32 %v930_v61 }
 0x508   :  { %2538 = vpow2.f32 %v1783_v63 }
 0x50f   :  { %v2533_v1 = vpop.eup %2532 }
 0x510   :  { %v934_v2 = vadd.f32 1.0, %v2533_v1  ;;  %v2535_v5 = vpop.eup %2534 }
 0x511   :  { %v940_v6 = vadd.f32 1.0, %v2535_v5  ;;  %v2537_v11 = vpop.eup %2536 }
 0x512   :  { %2540 = vrcp.f32 %v934_v2  ;;  %v2539_v12 = vpop.eup %2538 }
 0x513   :  { %2542 = vrcp.f32 %v940_v6  ;;  %v946_v20 = vadd.f32 1.0, %v2539_v12 }
 0x515   :  { %2544 = vrcp.f32 %v946_v20 }
 0x51c   :  { %v2541_v13 = vpop.eup %2540 }
 0x51d   :  { %v951_v16 = vmul.f32 %v2541_v13, %v2537_v11  ;;  %v2543_v19 = vpop.eup %2542 }
 0x51e   :  { %v950_v21 = vmul.f32 %v2543_v19, %v3130_v28  ;;  %v1784_v28 = vld [vmem:[%s3400_s0 + $0xa0] sm:$0xff] }
 0x51f   :  { %v2545_v36 = vpop.eup %2544 }
 0x520   :  { %v3180_v23 = vadd.f32 %v951_v16, %v950_v21 }
 0x522   :  { %2546 = vtanh.f32 %v3180_v23 }
 0x52c   :  { %v2547_v38 = vpop.eup %2546 }
 0x52d   :  { %v954_v43 = vmul.f32 %v2547_v38, %v2545_v36 }
 0x52f   :  { %1025 = vmatmul.mubr.f32.vlgmr.msra.gmra.mrb[10].mxu0 %v954_v43  ;;  %1096 = vmatmul.mubr.f32.vlgmr.msra.gmra.mrb[10].mxu1 %v954_v43 }
 0x530   :  { %2252 = vmatpush1.bf16.msra.mxu0 %v2662_v8  ;;  %2284 = vmatpush1.bf16.msra.mxu1 %v2711_v25 }
 0x531   :  { %2254 = vmatprep.subr.bf16.mxu0 %v2664_v9  ;;  %2286 = vmatprep.subr.bf16.mxu1 %v2736_v33 }
 0x532   :  { %1199 = vmatprep.mubr.f32.mxu0 %v2612_v3  ;;  %1270 = vmatprep.mubr.f32.mxu1 %v2612_v3 }
 0x534   :  { %2256 = vmatpush1.bf16.msra.mxu0 %v2680_v14  ;;  %2288 = vmatpush1.bf16.msra.mxu1 %v2747_v37 }
 0x535   :  { %2258 = vmatprep.subr.bf16.mxu0 %v2689_v17  ;;  %2290 = vmatprep.subr.bf16.mxu1 %v2771_v45 }
 0x538   :  { %2260 = vmatpush1.bf16.msra.mxu0 %v2714_v26  ;;  %2292 = vmatpush1.bf16.msra.mxu1 %v2780_v48 }
 0x539   :  { %2262 = vmatprep.subr.bf16.mxu0 %v2727_v30  ;;  %2294 = vmatprep.subr.bf16.mxu1 %v2792_v52 }
 0x53c   :  { %2264 = vmatpush1.bf16.msra.mxu0 %v2763_v42  ;;  %2296 = vmatpush1.bf16.msra.mxu1 %v2822_v62 }
 0x53d   :  { %2266 = vmatprep.subr.bf16.mxu0 %v2774_v46  ;;  %2298 = vmatprep.subr.bf16.mxu1 %v2828_v0 }
 0x540   :  { %2268 = vmatpush1.bf16.msra.mxu0 %v2801_v55  ;;  %2300 = vmatpush1.bf16.msra.mxu1 %v2858_v15 }
 0x541   :  { %2270 = vmatprep.subr.bf16.mxu0 %v2810_v58  ;;  %2302 = vmatprep.subr.bf16.mxu1 %v2864_v18 }
 0x544   :  { %2272 = vmatpush1.bf16.msra.mxu0 %v2843_v7  ;;  %2304 = vmatpush1.bf16.msra.mxu1 %v2891_v31 }
 0x545   :  { %2274 = vmatprep.subr.bf16.mxu0 %v2846_v10  ;;  %2306 = vmatprep.subr.bf16.mxu1 %v2894_v32 }
 0x548   :  { %2276 = vmatpush1.bf16.msra.mxu0 %v2879_v24  ;;  %2308 = vmatpush1.bf16.msra.mxu1 %v2913_v40 }
 0x549   :  { %2278 = vmatprep.subr.bf16.mxu0 %v2882_v27  ;;  %2310 = vmatprep.subr.bf16.mxu1 %v2916_v41 }
 0x54c   :  { %2280 = vmatpush1.bf16.msra.mxu0 %v2909_v39  ;;  %2312 = vmatpush1.bf16.msra.mxu1 %v2926_v47 }
 0x54d   :  { %2314 = vmatprep.subr.bf16.mxu0 %v2651_v4  ;;  %2346 = vmatprep.subr.bf16.mxu1 %v2703_v22 }
 0x602   :  { %v1026_v34 = vpop.f32.mrb[10].mxu0  ;;  %v1097_v35 = vpop.f32.mrb[10].mxu1 }
 0x603   :  { %v1102_v44 = vadd.f32 %v1784_v28, %v1026_v34  ;;  %v1028_v49 = vpop.f32.mrb[11].mxu0  ;;  %v1099_v50 = vpop.f32.mrb[11].mxu1  ;;  %v1104_v57 = vadd.f32 %v1786_v56, %v1097_v35  ;;  %v1792_v28 = vld [vmem:[%s3400_s0 + $0xc8] sm:$0xff] }
 0x604   :  { %v1103_v51 = vadd.f32 %v1785_v29, %v1028_v49  ;;  %v1105_v60 = vadd.f32 %v1787_v59, %v1099_v50 }
 0x605   :  { %v1788_v53 = vmul.f32 -1.442695, %v1102_v44  ;;  %v1790_v61 = vmul.f32 -1.442695, %v1104_v57 }
 0x606   :  { %v1789_v54 = vmul.f32 -1.442695, %v1103_v51 }
 0x607   :  { %2548 = vpow2.f32 %v1788_v53 }
 0x608   :  { %2550 = vpow2.f32 %v1789_v54  ;;  %v1794_v54 = vld [vmem:[%s3400_s0 + $0xd8] sm:$0xff] }
 0x609   :  { %2552 = vtanh.f32 %v1105_v60 }
 0x60a   :  { %2554 = vpow2.f32 %v1790_v61 }
 0x611   :  { %v2549_v63 = vpop.eup %2548 }
 0x612   :  { %v1109_v1 = vadd.f32 1.0, %v2549_v63  ;;  %v2551_v2 = vpop.eup %2550 }
 0x613   :  { %v1115_v5 = vadd.f32 1.0, %v2551_v2  ;;  %v2553_v6 = vpop.eup %2552 }
 0x614   :  { %2556 = vrcp.f32 %v1109_v1  ;;  %v2555_v11 = vpop.eup %2554 }
 0x615   :  { %2558 = vrcp.f32 %v1115_v5  ;;  %v1121_v19 = vadd.f32 1.0, %v2555_v11 }
 0x617   :  { %2560 = vrcp.f32 %v1121_v19 }
 0x61e   :  { %v2557_v12 = vpop.eup %2556 }
 0x61f   :  { %v1126_v13 = vmul.f32 %v2557_v12, %v2553_v6  ;;  %v2559_v16 = vpop.eup %2558 }
 0x620   :  { %v1125_v20 = vmul.f32 %v2559_v16, %v3180_v23  ;;  %v1791_v23 = vld [vmem:[%s3400_s0 + $0xc0] sm:$0xff] }
 0x621   :  { %v2561_v36 = vpop.eup %2560 }
 0x622   :  { %v3230_v21 = vadd.f32 %v1126_v13, %v1125_v20 }
 0x624   :  { %2562 = vtanh.f32 %v3230_v21 }
 0x62e   :  { %v2563_v38 = vpop.eup %2562 }
 0x62f   :  { %v1129_v43 = vmul.f32 %v2563_v38, %v2561_v36  ;;  %v1656_v38 = vld [vmem:[%s3401_s2 + $0x8] sm:$0xff] }
 0x631   :  { %1200 = vmatmul.mubr.f32.vlgmr.msra.gmra.mrb[12].mxu0 %v1129_v43  ;;  %1271 = vmatmul.mubr.f32.vlgmr.msra.gmra.mrb[12].mxu1 %v1129_v43 }
 0x632   :  { %2316 = vmatpush1.bf16.msra.mxu0 %v2662_v8  ;;  %2348 = vmatpush1.bf16.msra.mxu1 %v2711_v25 }
 0x633   :  { %2318 = vmatprep.subr.bf16.mxu0 %v2664_v9  ;;  %2350 = vmatprep.subr.bf16.mxu1 %v2736_v33 }
 0x634   :  { %1374 = vmatprep.mubr.f32.mxu0 %v2612_v3  ;;  %1445 = vmatprep.mubr.f32.mxu1 %v2612_v3 }
 0x636   :  { %2320 = vmatpush1.bf16.msra.mxu0 %v2680_v14  ;;  %2352 = vmatpush1.bf16.msra.mxu1 %v2747_v37 }
 0x637   :  { %2322 = vmatprep.subr.bf16.mxu0 %v2689_v17  ;;  %2354 = vmatprep.subr.bf16.mxu1 %v2771_v45 }
 0x63a   :  { %2324 = vmatpush1.bf16.msra.mxu0 %v2714_v26  ;;  %2356 = vmatpush1.bf16.msra.mxu1 %v2780_v48 }
 0x63b   :  { %2326 = vmatprep.subr.bf16.mxu0 %v2727_v30  ;;  %2358 = vmatprep.subr.bf16.mxu1 %v2792_v52 }
 0x63e   :  { %2328 = vmatpush1.bf16.msra.mxu0 %v2763_v42  ;;  %2360 = vmatpush1.bf16.msra.mxu1 %v2822_v62 }
 0x63f   :  { %2330 = vmatprep.subr.bf16.mxu0 %v2774_v46  ;;  %2362 = vmatprep.subr.bf16.mxu1 %v2828_v0 }
 0x642   :  { %2332 = vmatpush1.bf16.msra.mxu0 %v2801_v55  ;;  %2364 = vmatpush1.bf16.msra.mxu1 %v2858_v15 }
 0x643   :  { %2334 = vmatprep.subr.bf16.mxu0 %v2810_v58  ;;  %2366 = vmatprep.subr.bf16.mxu1 %v2864_v18 }
 0x646   :  { %2336 = vmatpush1.bf16.msra.mxu0 %v2843_v7  ;;  %2368 = vmatpush1.bf16.msra.mxu1 %v2891_v31 }
 0x647   :  { %2338 = vmatprep.subr.bf16.mxu0 %v2846_v10  ;;  %2370 = vmatprep.subr.bf16.mxu1 %v2894_v32 }
 0x64a   :  { %2340 = vmatpush1.bf16.msra.mxu0 %v2879_v24  ;;  %2372 = vmatpush1.bf16.msra.mxu1 %v2913_v40 }
 0x64b   :  { %2342 = vmatprep.subr.bf16.mxu0 %v2882_v27  ;;  %2374 = vmatprep.subr.bf16.mxu1 %v2916_v41 }
 0x64e   :  { %2344 = vmatpush1.bf16.msra.mxu0 %v2909_v39  ;;  %2376 = vmatpush1.bf16.msra.mxu1 %v2926_v47 }
 0x64f   :  { %2378 = vmatprep.subr.bf16.mxu0 %v2651_v4  ;;  %2410 = vmatprep.subr.bf16.mxu1 %v2703_v22  ;;  %v1793_v4 = vld [vmem:[%s3400_s0 + $0xd0] sm:$0xff] }
 0x704   :  { %v1201_v29 = vpop.f32.mrb[12].mxu0  ;;  %v1272_v34 = vpop.f32.mrb[12].mxu1 }
 0x705   :  { %v1277_v35 = vadd.f32 %v1791_v23, %v1201_v29  ;;  %v1203_v44 = vpop.f32.mrb[13].mxu0  ;;  %v1274_v49 = vpop.f32.mrb[13].mxu1  ;;  %v1279_v22 = vadd.f32 %v1793_v4, %v1272_v34  ;;  %v2613_v23 = vmov 0.0|0.0   ;;  %v1658_v29 = vld [vmem:[%s3401_s2 + $0x18] sm:$0xff]  ;;  %v1663_v4 = vld [vmem:[%s3401_s2 + $0x40] sm:$0xff] }
 0x706   :  { %v1278_v50 = vadd.f32 %v1792_v28, %v1203_v44  ;;  %v1280_v56 = vadd.f32 %v1794_v54, %v1274_v49  ;;  %v1657_v28 = vld [vmem:[%s3401_s2 + $0x10] sm:$0xff]  ;;  %v1660_v44 = vld [vmem:[%s3401_s2 + $0x28] sm:$0xff] }
 0x707   :  { %v1795_v51 = vmul.f32 -1.442695, %v1277_v35  ;;  %v1797_v57 = vmul.f32 -1.442695, %v1279_v22  ;;  %v2445_v34 = vpack.c.bf16 %v1658_v29, %v1657_v28  ;;  %v1659_v35 = vld [vmem:[%s3401_s2 + $0x20] sm:$0xff]  ;;  %v1664_v22 = vld [vmem:[%s3401_s2 + $0x48] sm:$0xff] }
 0x708   :  { %v1796_v53 = vmul.f32 -1.442695, %v1278_v50  ;;  %v2448_v49 = vpack.c.bf16 %v1660_v44, %v1659_v35  ;;  %v1661_v50 = vld [vmem:[%s3401_s2 + $0x30] sm:$0xff]  ;;  %v2454_v54 = vpack.c.bf16 %v1664_v22, %v1663_v4 }
 0x709   :  { %2564 = vpow2.f32 %v1795_v51  ;;  %v1662_v51 = vld [vmem:[%s3401_s2 + $0x38] sm:$0xff] }
 0x70a   :  { %2566 = vpow2.f32 %v1796_v53  ;;  %v2451_v53 = vpack.c.bf16 %v1662_v51, %v1661_v50 }
 0x70b   :  { %2568 = vtanh.f32 %v1280_v56  ;;  %v1665_v56 = vld [vmem:[%s3401_s2 + $0x50] sm:$0xff] }
 0x70c   :  { %2570 = vpow2.f32 %v1797_v57  ;;  %v1666_v57 = vld [vmem:[%s3401_s2 + $0x58] sm:$0xff] }
 0x713   :  { %v2565_v59 = vpop.eup %2564 }
 0x714   :  { %v1284_v60 = vadd.f32 1.0, %v2565_v59  ;;  %v2567_v61 = vpop.eup %2566  ;;  %v2457_v59 = vpack.c.bf16 %v1666_v57, %v1665_v56 }
 0x715   :  { %v1290_v63 = vadd.f32 1.0, %v2567_v61  ;;  %v2569_v1 = vpop.eup %2568  ;;  %v1668_v61 = vld [vmem:[%s3401_s2 + $0x68] sm:$0xff] }
 0x716   :  { %2572 = vrcp.f32 %v1284_v60  ;;  %v2571_v2 = vpop.eup %2570  ;;  %v1667_v60 = vld [vmem:[%s3401_s2 + $0x60] sm:$0xff] }
 0x717   :  { %2574 = vrcp.f32 %v1290_v63  ;;  %v1296_v12 = vadd.f32 1.0, %v2571_v2  ;;  %v2460_v63 = vpack.c.bf16 %v1668_v61, %v1667_v60  ;;  %v1670_v2 = vld [vmem:[%s3401_s2 + $0x78] sm:$0xff] }
 0x719   :  { %2576 = vrcp.f32 %v1296_v12 }
 0x720   :  { %v2573_v5 = vpop.eup %2572 }
 0x721   :  { %v1301_v6 = vmul.f32 %v2573_v5, %v2569_v1  ;;  %v2575_v11 = vpop.eup %2574  ;;  %v1669_v1 = vld [vmem:[%s3401_s2 + $0x70] sm:$0xff] }
 0x722   :  { %v1300_v13 = vmul.f32 %v2575_v11, %v3230_v21  ;;  %v1655_v21 = vld [vmem:[%s3401_s2] sm:$0xff]  ;;  %v2463_v5 = vpack.c.bf16 %v1670_v2, %v1669_v1 }
 0x723   :  { %v2577_v19 = vpop.eup %2576  ;;  %v2442_v43 = vpack.c.bf16 %v1656_v38, %v1655_v21 }
 0x724   :  { %v3280_v16 = vadd.f32 %v1301_v6, %v1300_v13  ;;  %v1805_v6 = vld [vmem:[%s3400_s0 + $0x100] sm:$0xff] }
 0x726   :  { %2578 = vtanh.f32 %v3280_v16 }
 0x730   :  { %v2579_v20 = vpop.eup %2578 }
 0x731   :  { %v1304_v36 = vmul.f32 %v2579_v20, %v2577_v19 }
 0x733   :  { %1375 = vmatmul.mubr.f32.vlgmr.msra.gmra.mrb[14].mxu0 %v1304_v36  ;;  %1446 = vmatmul.mubr.f32.vlgmr.msra.gmra.mrb[14].mxu1 %v1304_v36 }
 0x734   :  { %2380 = vmatpush1.bf16.msra.mxu0 %v2662_v8  ;;  %2412 = vmatpush1.bf16.msra.mxu1 %v2711_v25  ;;  %v1798_v8 = vld [vmem:[%s3400_s0 + $0xe0] sm:$0xff] }
 0x735   :  { %2382 = vmatprep.subr.bf16.mxu0 %v2664_v9  ;;  %2414 = vmatprep.subr.bf16.mxu1 %v2736_v33  ;;  %v1799_v9 = vld [vmem:[%s3400_s0 + $0xe8] sm:$0xff] }
 0x736   :  { %1549 = vmatprep.mubr.f32.mxu0 %v2612_v3  ;;  %1620 = vmatprep.mubr.f32.mxu1 %v2612_v3 }
 0x738   :  { %2384 = vmatpush1.bf16.msra.mxu0 %v2680_v14  ;;  %2416 = vmatpush1.bf16.msra.mxu1 %v2747_v37 }
 0x739   :  { %2386 = vmatprep.subr.bf16.mxu0 %v2689_v17  ;;  %2418 = vmatprep.subr.bf16.mxu1 %v2771_v45  ;;  %v1800_v45 = vld [vmem:[%s3400_s0 + $0xf0] sm:$0xff] }
 0x73c   :  { %2388 = vmatpush1.bf16.msra.mxu0 %v2714_v26  ;;  %2420 = vmatpush1.bf16.msra.mxu1 %v2780_v48  ;;  %v1801_v48 = vld [vmem:[%s3400_s0 + $0xf8] sm:$0xff] }
 0x73d   :  { %2390 = vmatprep.subr.bf16.mxu0 %v2727_v30  ;;  %2422 = vmatprep.subr.bf16.mxu1 %v2792_v52 }
 0x740   :  { %2392 = vmatpush1.bf16.msra.mxu0 %v2763_v42  ;;  %2424 = vmatpush1.bf16.msra.mxu1 %v2822_v62 }
 0x741   :  { %2394 = vmatprep.subr.bf16.mxu0 %v2774_v46  ;;  %2426 = vmatprep.subr.bf16.mxu1 %v2828_v0 }
 0x744   :  { %2396 = vmatpush1.bf16.msra.mxu0 %v2801_v55  ;;  %2428 = vmatpush1.bf16.msra.mxu1 %v2858_v15 }
 0x745   :  { %2398 = vmatprep.subr.bf16.mxu0 %v2810_v58  ;;  %2430 = vmatprep.subr.bf16.mxu1 %v2864_v18 }
 0x748   :  { %2400 = vmatpush1.bf16.msra.mxu0 %v2843_v7  ;;  %2432 = vmatpush1.bf16.msra.mxu1 %v2891_v31 }
 0x749   :  { %2402 = vmatprep.subr.bf16.mxu0 %v2846_v10  ;;  %2434 = vmatprep.subr.bf16.mxu1 %v2894_v32 }
 0x74c   :  { %2404 = vmatpush1.bf16.msra.mxu0 %v2879_v24  ;;  %2436 = vmatpush1.bf16.msra.mxu1 %v2913_v40 }
 0x74d   :  { %2406 = vmatprep.subr.bf16.mxu0 %v2882_v27  ;;  %2438 = vmatprep.subr.bf16.mxu1 %v2916_v41 }
 0x750   :  { %2408 = vmatpush1.bf16.msra.mxu0 %v2909_v39  ;;  %2440 = vmatpush1.bf16.msra.mxu1 %v2926_v47 }
 0x751   :  { %2441 = vmatprep.subr.bf16.mxu0 %v2613_v23 }
 0x806   :  { %v1376_v14 = vpop.f32.mrb[14].mxu0  ;;  %v1447_v17 = vpop.f32.mrb[14].mxu1 }
 0x807   :  { %v1452_v25 = vadd.f32 %v1798_v8, %v1376_v14  ;;  %v1378_v26 = vpop.f32.mrb[15].mxu0  ;;  %v1449_v30 = vpop.f32.mrb[15].mxu1  ;;  %v1454_v46 = vadd.f32 %v1800_v45, %v1447_v17  ;;  %v1808_v17 = vld [vmem:[%s3400_s0 + $0x118] sm:$0xff] }
 0x808   :  { %v1453_v33 = vadd.f32 %v1799_v9, %v1378_v26  ;;  %v1455_v52 = vadd.f32 %v1801_v48, %v1449_v30  ;;  %v1807_v9 = vld [vmem:[%s3400_s0 + $0x110] sm:$0xff] }
 0x809   :  { %v1802_v37 = vmul.f32 -1.442695, %v1452_v25  ;;  %v1804_v55 = vmul.f32 -1.442695, %v1454_v46 }
 0x80a   :  { %v1803_v42 = vmul.f32 -1.442695, %v1453_v33 }
 0x80b   :  { %2580 = vpow2.f32 %v1802_v37 }
 0x80c   :  { %2582 = vpow2.f32 %v1803_v42 }
 0x80d   :  { %2584 = vtanh.f32 %v1455_v52 }
 0x80e   :  { %2586 = vpow2.f32 %v1804_v55 }
 0x815   :  { %v2581_v58 = vpop.eup %2580 }
 0x816   :  { %v1459_v62 = vadd.f32 1.0, %v2581_v58  ;;  %v2583_v0 = vpop.eup %2582 }
 0x817   :  { %v1465_v7 = vadd.f32 1.0, %v2583_v0  ;;  %v2585_v10 = vpop.eup %2584 }
 0x818   :  { %2588 = vrcp.f32 %v1459_v62  ;;  %v2587_v15 = vpop.eup %2586 }
 0x819   :  { %2590 = vrcp.f32 %v1465_v7  ;;  %v1471_v31 = vadd.f32 1.0, %v2587_v15 }
 0x81b   :  { %2592 = vrcp.f32 %v1471_v31 }
 0x822   :  { %v2589_v18 = vpop.eup %2588 }
 0x823   :  { %v1476_v24 = vmul.f32 %v2589_v18, %v2585_v10  ;;  %v2591_v27 = vpop.eup %2590  ;;  %v1812_v18 = vld [vmem:[%s3402_s3] ss:$0 sm:$0xff] }
 0x824   :  { %v1475_v32 = vmul.f32 %v2591_v27, %v3280_v16 }
 0x825   :  { %v2593_v40 = vpop.eup %2592 }
 0x826   :  { %v3328_v39 = vadd.f32 %v1476_v24, %v1475_v32 }
 0x828   :  { %2594 = vtanh.f32 %v3328_v39 }
 0x832   :  { %v2595_v41 = vpop.eup %2594 }
 0x833   :  { %v1479_v47 = vmul.f32 %v2595_v41, %v2593_v40 }
 0x835   :  { %1550 = vmatmul.mubr.f32.vlgmr.msra.gmra.mrb[16].mxu0 %v1479_v47  ;;  %1621 = vmatmul.mubr.f32.vlgmr.msra.gmra.mrb[16].mxu1 %v1479_v47 }
 0x836   :  { %2443 = vmatpush3.bf16.msra.mxu0 %v2442_v43  ;;  %1862 = vmatprep.mubr.msk.f32.mxu0 %vm2614_vm0, %v2612_v3  ;;  %v1806_v3 = vld [vmem:[%s3400_s0 + $0x108] sm:$0xff] }
 0x837   :  { %2444 = vmatprep.subr.bf16.mxu0 %v2613_v23 }
 0x83a   :  { %2446 = vmatpush3.bf16.msra.mxu0 %v2445_v34 }
 0x83b   :  { %2447 = vmatprep.subr.bf16.mxu0 %v2613_v23 }
 0x83e   :  { %2449 = vmatpush3.bf16.msra.mxu0 %v2448_v49 }
 0x83f   :  { %2450 = vmatprep.subr.bf16.mxu0 %v2613_v23 }
 0x842   :  { %2452 = vmatpush3.bf16.msra.mxu0 %v2451_v53 }
 0x843   :  { %2453 = vmatprep.subr.bf16.mxu0 %v2613_v23 }
 0x846   :  { %2455 = vmatpush3.bf16.msra.mxu0 %v2454_v54 }
 0x847   :  { %2456 = vmatprep.subr.bf16.mxu0 %v2613_v23 }
 0x84a   :  { %2458 = vmatpush3.bf16.msra.mxu0 %v2457_v59 }
 0x84b   :  { %2459 = vmatprep.subr.bf16.mxu0 %v2613_v23 }
 0x84e   :  { %2461 = vmatpush3.bf16.msra.mxu0 %v2460_v63 }
 0x84f   :  { %2462 = vmatprep.subr.bf16.mxu0 %v2613_v23 }
 0x852   :  { %2464 = vmatpush3.bf16.msra.mxu0 %v2463_v5 }
 0x908   :  { %v1551_v11 = vpop.f32.mrb[16].mxu0  ;;  %v1622_v12 = vpop.f32.mrb[16].mxu1 }
 0x909   :  { %v1627_v13 = vadd.f32 %v1805_v6, %v1551_v11  ;;  %v1553_v16 = vpop.f32.mrb[17].mxu0  ;;  %v1624_v19 = vpop.f32.mrb[17].mxu1  ;;  %v1629_v14 = vadd.f32 %v1807_v9, %v1622_v12 }
 0x90a   :  { %v1628_v20 = vadd.f32 %v1806_v3, %v1553_v16  ;;  %v1630_v25 = vadd.f32 %v1808_v17, %v1624_v19 }
 0x90b   :  { %v1809_v36 = vmul.f32 -1.442695, %v1627_v13  ;;  %v1811_v26 = vmul.f32 -1.442695, %v1629_v14 }
 0x90c   :  { %v1810_v8 = vmul.f32 -1.442695, %v1628_v20 }
 0x90d   :  { %2596 = vpow2.f32 %v1809_v36 }
 0x90e   :  { %2598 = vpow2.f32 %v1810_v8 }
 0x90f   :  { %2600 = vtanh.f32 %v1630_v25 }
 0x910   :  { %2602 = vpow2.f32 %v1811_v26 }
 0x917   :  { %v2597_v30 = vpop.eup %2596 }
 0x918   :  { %v1634_v33 = vadd.f32 1.0, %v2597_v30  ;;  %v2599_v37 = vpop.eup %2598 }
 0x919   :  { %v1640_v42 = vadd.f32 1.0, %v2599_v37  ;;  %v2601_v45 = vpop.eup %2600 }
 0x91a   :  { %2604 = vrcp.f32 %v1634_v33  ;;  %v2603_v46 = vpop.eup %2602 }
 0x91b   :  { %2606 = vrcp.f32 %v1640_v42  ;;  %v1646_v58 = vadd.f32 1.0, %v2603_v46 }
 0x91d   :  { %2608 = vrcp.f32 %v1646_v58 }
 0x924   :  { %v2605_v48 = vpop.eup %2604 }
 0x925   :  { %v1651_v52 = vmul.f32 %v2605_v48, %v2601_v45  ;;  %v2607_v55 = vpop.eup %2606 }
 0x926   :  { %v1650_v62 = vmul.f32 %v2607_v55, %v3328_v39 }
 0x927   :  { %v2609_v7 = vpop.eup %2608 }
 0x928   :  { %v1652_v0 = vadd.f32 %v1651_v52, %v1650_v62 }
 0x92a   :  { %2610 = vtanh.f32 %v1652_v0 }
 0x934   :  { %v2611_v10 = vpop.eup %2610 }
 0x935   :  { %v1654_v15 = vmul.f32 %v2611_v10, %v2609_v7 }
 0x937   :  { %1863 = vmatmul.mubr.f32.vlgmr.msra.gmra.mrb[18].mxu0 %v1654_v15 }
 0xa0a   :  { %v1744_v24 = vpop.f32.mrb[18].mxu0 }
 0xa0b   :  { %v1745_v27 = vadd.f32 %v1812_v18, %v1744_v24  ;;  %v1864_v31 = vpop.f32.mrb[19].mxu0 }
 0xa0d   :  { %1748 = vst [vmem:[%s3403_s4] sm:$0xff] %v1745_v27 }

</bundles_post_ra>
